<compile_context>
chip_gen: v7x
topology: tpu7x:2x2x1
jax: 0.10.0
libtpu: 0.0.40
codegen_flags: <defaults>
</compile_context>

<pallas_src>
import jax
import jax.numpy as jnp
from jax.experimental import pallas as pl
from jax.experimental.pallas import tpu as pltpu

# ---------------- problem sizes (small, synthetic) ----------------
B = 200        # batch (deliberately NOT a multiple of the tile -> padded path)
D = 16         # input (tabular) feature dim
H = 32         # hidden / output dim of feature transformers
N_STEPS = 3    # number of TabNet decision steps

D_PAD = ((D + 127) // 128) * 128      # lane-dense feature dim   (=128)
H_PAD = ((H + 127) // 128) * 128      # lane-dense hidden dim    (=128)
NEG_INF = -1e30                       # softmax exclusion for padded feature lanes


def _pick_batch_tile():
    """Generation-aware batch tile (MXU M dimension)."""
    try:
        kind = jax.devices()[0].device_kind.lower()
    except Exception:
        return 128
    # Single-TensorCore generations (v5e, v6e): bigger tile -> fewer serial grid steps.
    if ("v5e" in kind) or ("v5 lite" in kind) or ("v5lite" in kind) or ("v6" in kind):
        return 256
    # v7x (2 TCs/chip) and anything unknown: keep 128-row tiles so the grid
    # stays >= 2 and both cores get work via dimension_semantics=("parallel",).
    return 128


TB = _pick_batch_tile()


# ---------------------------- kernel ----------------------------
def tabnet_kernel(x_ref, w_init_ref, b_init_ref,
                  w_att_ref, b_att_ref, w_tr_ref, b_tr_ref,
                  out_ref):
    x_bf = x_ref[...]                                          # (TB, D_PAD) bf16

    # ---- initial_transform: Linear(D->H) + ReLU (lane-padded) ----
    x_t = jnp.dot(x_bf, w_init_ref[...],
                  preferred_element_type=jnp.float32) + b_init_ref[...]
    x_t_bf = jnp.maximum(x_t, 0.0).astype(jnp.bfloat16)        # (TB, H_PAD) bf16

    prior = jnp.ones(x_bf.shape, jnp.float32)                  # (TB, D_PAD) f32
    out_agg = jnp.zeros((x_bf.shape[0], H_PAD), jnp.float32)   # (TB, H_PAD) f32

    for s in range(N_STEPS):
        # ---- attentive[s]: Linear(H->D), * prior, softmax over feature lanes ----
        # (padded lanes carry a NEG_INF bias baked in at pack time -> mask == 0 there)
        logits = (jnp.dot(x_t_bf, w_att_ref[s],
                          preferred_element_type=jnp.float32) + b_att_ref[s]) * prior
        e = jnp.exp(logits - jnp.max(logits, axis=-1, keepdims=True))
        mask = e * pl.reciprocal(jnp.sum(e, axis=-1, keepdims=True), approx=True)

        # ---- mask the raw input (per-step f32 cast; only x_bf is carried) ----
        x_masked = (x_bf.astype(jnp.float32) * mask).astype(jnp.bfloat16)

        # ---- transformers[s]: Linear(D->H) + ReLU ----
        step_out = jnp.dot(x_masked, w_tr_ref[s],
                           preferred_element_type=jnp.float32) + b_tr_ref[s]
        out_agg = out_agg + jnp.maximum(step_out, 0.0)

        # ---- prior relaxation ----
        prior = prior * (1.0 - mask)

    out_ref[...] = out_agg.astype(out_ref.dtype)


# ------------------------ one-time packing ------------------------
def pack_params(params):
    """Zero-pad to lane-dense shapes, bake NEG_INF softmax exclusion into the
    attentive bias, cast MXU operands to bf16.  Call ONCE at init."""
    w_init, b_init, w_att, b_att, w_tr, b_tr = params

    w_init_p = jnp.zeros((D_PAD, H_PAD), jnp.bfloat16).at[:D, :H].set(
        w_init.astype(jnp.bfloat16))
    b_init_p = jnp.zeros((1, H_PAD), jnp.float32).at[:, :H].set(b_init)

    # Padded feature lanes get a NEG_INF bias -> excluded from softmax on every
    # step (mask=0 there keeps prior=1, so the exclusion is self-sustaining).
    w_att_p = jnp.zeros((N_STEPS, H_PAD, D_PAD), jnp.bfloat16).at[:, :H, :D].set(
        w_att.astype(jnp.bfloat16))
    b_att_p = jnp.full((N_STEPS, 1, D_PAD), NEG_INF, jnp.float32).at[:, :, :D].set(b_att)

    w_tr_p = jnp.zeros((N_STEPS, D_PAD, H_PAD), jnp.bfloat16).at[:, :D, :H].set(
        w_tr.astype(jnp.bfloat16))
    b_tr_p = jnp.zeros((N_STEPS, 1, H_PAD), jnp.float32).at[:, :, :H].set(b_tr)

    return w_init_p, b_init_p, w_att_p, b_att_p, w_tr_p, b_tr_p


# --------------------------- forward ---------------------------
@jax.jit
def tabnet_feature_extractor(x, w_init_p, b_init_p, w_att_p, b_att_p, w_tr_p, b_tr_p):
    b_in, d_in = x.shape
    assert d_in == D

    n_bt = pl.cdiv(b_in, TB)          # ragged batch handled by padding (fused under jit)
    b_pad = n_bt * TB

    x_p = jnp.zeros((b_pad, D_PAD), jnp.bfloat16).at[:b_in, :D].set(
        x.astype(jnp.bfloat16))

    resident = pl.BlockSpec(memory_space=pltpu.MemorySpace.VMEM)  # single-buffered weights

    out_p = pl.pallas_call(
        tabnet_kernel,
        out_shape=jax.ShapeDtypeStruct((b_pad, H_PAD), jnp.float32),
        grid_spec=pltpu.PrefetchScalarGridSpec(
            num_scalar_prefetch=0,
            grid=(n_bt,),
            in_specs=[
                pl.BlockSpec((TB, D_PAD), lambda i: (i, 0)),  # x (batch-tiled)
                resident,                                     # w_init  (D_PAD, H_PAD)
                resident,                                     # b_init  (1, H_PAD)
                resident,                                     # w_att   (N_STEPS, H_PAD, D_PAD)
                resident,                                     # b_att   (N_STEPS, 1, D_PAD)
                resident,                                     # w_tr    (N_STEPS, D_PAD, H_PAD)
                resident,                                     # b_tr    (N_STEPS, 1, H_PAD)
            ],
            out_specs=pl.BlockSpec((TB, H_PAD), lambda i: (i, 0)),
        ),
        compiler_params=pltpu.CompilerParams(
            dimension_semantics=("parallel",),        # shard grid across TCs when >= 2 tiles
            vmem_limit_bytes=32 * 1024 * 1024),       # explicit budget (tiny footprint anyway)
    )(x_p, w_init_p, b_init_p, w_att_p, b_att_p, w_tr_p, b_tr_p)

    return out_p[:b_in, :H]


# --------------------------- test helpers ---------------------------
def make_params(key):
    ks = jax.random.split(key, 6)
    scale = 0.1
    w_init = scale * jax.random.normal(ks[0], (D, H), jnp.float32)
    b_init = scale * jax.random.normal(ks[1], (1, H), jnp.float32)
    w_att = scale * jax.random.normal(ks[2], (N_STEPS, H, D), jnp.float32)
    b_att = scale * jax.random.normal(ks[3], (N_STEPS, 1, D), jnp.float32)
    w_tr = scale * jax.random.normal(ks[4], (N_STEPS, D, H), jnp.float32)
    b_tr = scale * jax.random.normal(ks[5], (N_STEPS, 1, H), jnp.float32)
    return w_init, b_init, w_att, b_att, w_tr, b_tr


def reference_forward(x, params):
    """Pure-JAX reference matching the PyTorch forward semantics.

    Matmul operands are cast to bf16 (f32 accumulation) exactly like the
    kernel, so the comparison isolates kernel logic rather than dtype policy.
    """
    w_init, b_init, w_att, b_att, w_tr, b_tr = params
    xb = x.astype(jnp.bfloat16)
    x_raw = xb.astype(jnp.float32)

    x_t = jnp.maximum(
        jnp.dot(xb, w_init.astype(jnp.bfloat16),
                preferred_element_type=jnp.float32) + b_init, 0.0)
    xt_b = x_t.astype(jnp.bfloat16)

    prior = jnp.ones_like(x_raw)
    out_agg = jnp.zeros((x.shape[0], H), jnp.float32)
    for s in range(N_STEPS):
        logits = (jnp.dot(xt_b, w_att[s].astype(jnp.bfloat16),
                          preferred_element_type=jnp.float32) + b_att[s]) * prior
        mask = jax.nn.softmax(logits, axis=-1)
        x_masked = (x_raw * mask).astype(jnp.bfloat16)
        step_out = jnp.dot(x_masked, w_tr[s].astype(jnp.bfloat16),
                           preferred_element_type=jnp.float32) + b_tr[s]
        out_agg = out_agg + jnp.maximum(step_out, 0.0)
        prior = prior * (1.0 - mask)
    return out_agg


if __name__ == "__main__":
    key = jax.random.PRNGKey(0)
    kx, kp = jax.random.split(key)
    x = jax.random.normal(kx, (B, D), jnp.float32)
    params = make_params(kp)

    packed = pack_params(params)      # one-time packing, outside the per-call path

    out = tabnet_feature_extractor(x, *packed)
    out = jax.block_until_ready(out)

    ref = reference_forward(x, params)
    assert out.shape == (B, H)
    max_err = float(jnp.max(jnp.abs(out - ref)))
    assert jnp.allclose(out, ref, atol=5e-3, rtol=5e-3), f"mismatch vs reference: {max_err}"
    print("KERNEL_OK")
</pallas_src>

<mosaic_0001>
module attributes {stable_mosaic.version = 11 : i64} {
  func.func @tabnet_kernel(%arg0: i32, %arg1: memref<128x128xbf16, #tpu.memory_space<vmem>>, %arg2: memref<128x128xbf16, #tpu.memory_space<vmem>>, %arg3: memref<1x128xf32, #tpu.memory_space<vmem>>, %arg4: memref<3x128x128xbf16, #tpu.memory_space<vmem>>, %arg5: memref<3x1x128xf32, #tpu.memory_space<vmem>>, %arg6: memref<3x128x128xbf16, #tpu.memory_space<vmem>>, %arg7: memref<3x1x128xf32, #tpu.memory_space<vmem>>, %arg8: memref<128x128xf32, #tpu.memory_space<vmem>>) attributes {dimension_semantics = [#tpu.dimension_semantics<parallel>], iteration_bounds = array<i64: 2>, scalar_prefetch = 0 : i64, scratch_operands = 0 : i64, tpu.core_type = #tpu.core_type<tc>, window_params = [{transform_indices = @transform_0, window_bounds = array<i64: 128, 128>}, {pipeline_mode = #tpu.pipeline_mode<synchronous>, transform_indices = @transform_1, window_bounds = array<i64: 128, 128>}, {pipeline_mode = #tpu.pipeline_mode<synchronous>, transform_indices = @transform_2, window_bounds = array<i64: 1, 128>}, {pipeline_mode = #tpu.pipeline_mode<synchronous>, transform_indices = @transform_3, window_bounds = array<i64: 3, 128, 128>}, {pipeline_mode = #tpu.pipeline_mode<synchronous>, transform_indices = @transform_4, window_bounds = array<i64: 3, 1, 128>}, {pipeline_mode = #tpu.pipeline_mode<synchronous>, transform_indices = @transform_5, window_bounds = array<i64: 3, 128, 128>}, {pipeline_mode = #tpu.pipeline_mode<synchronous>, transform_indices = @transform_6, window_bounds = array<i64: 3, 1, 128>}, {transform_indices = @transform_7, window_bounds = array<i64: 128, 128>}]} {
    %c0 = arith.constant 0 : index
    %c0_0 = arith.constant 0 : index
    %0 = vector.load %arg1[%c0, %c0_0] : memref<128x128xbf16, #tpu.memory_space<vmem>>, vector<128x128xbf16>
    %c0_1 = arith.constant 0 : index
    %c0_2 = arith.constant 0 : index
    %1 = vector.load %arg2[%c0_1, %c0_2] : memref<128x128xbf16, #tpu.memory_space<vmem>>, vector<128x128xbf16>
    %cst = arith.constant dense<0.000000e+00> : vector<128x128xf32>
    %2 = tpu.matmul %0, %1, %cst {dimension_numbers = #tpu.dot_dimension_numbers<[1], [0], [0], [1], [0, 0, 1, 1], [], []>} : vector<128x128xbf16>, vector<128x128xbf16>, vector<128x128xf32> -> vector<128x128xf32>
    %c0_3 = arith.constant 0 : index
    %c0_4 = arith.constant 0 : index
    %3 = vector.load %arg3[%c0_3, %c0_4] : memref<1x128xf32, #tpu.memory_space<vmem>>, vector<1x128xf32>
    %4 = vector.broadcast %3 : vector<1x128xf32> to vector<128x128xf32>
    %5 = arith.addf %2, %4 : vector<128x128xf32>
    %cst_5 = arith.constant 0.000000e+00 : f32
    %6 = vector.broadcast %cst_5 : f32 to vector<128x128xf32>
    %7 = arith.maximumf %5, %6 : vector<128x128xf32>
    %8 = arith.truncf %7 : vector<128x128xf32> to vector<128x128xbf16>
    %cst_6 = arith.constant 1.000000e+00 : f32
    %9 = vector.broadcast %cst_6 : f32 to vector<128x128xf32>
    %cst_7 = arith.constant 0.000000e+00 : f32
    %10 = vector.broadcast %cst_7 : f32 to vector<128x128xf32>
    %c0_8 = arith.constant 0 : index
    %c0_9 = arith.constant 0 : index
    %c0_10 = arith.constant 0 : index
    %11 = vector.load %arg4[%c0_8, %c0_9, %c0_10] : memref<3x128x128xbf16, #tpu.memory_space<vmem>>, vector<1x128x128xbf16>
    %12 = vector.shape_cast %11 : vector<1x128x128xbf16> to vector<128x128xbf16>
    %cst_11 = arith.constant dense<0.000000e+00> : vector<128x128xf32>
    %13 = tpu.matmul %8, %12, %cst_11 {dimension_numbers = #tpu.dot_dimension_numbers<[1], [0], [0], [1], [0, 0, 1, 1], [], []>} : vector<128x128xbf16>, vector<128x128xbf16>, vector<128x128xf32> -> vector<128x128xf32>
    %c0_12 = arith.constant 0 : index
    %c0_13 = arith.constant 0 : index
    %c0_14 = arith.constant 0 : index
    %14 = vector.load %arg5[%c0_12, %c0_13, %c0_14] : memref<3x1x128xf32, #tpu.memory_space<vmem>>, vector<1x1x128xf32>
    %15 = vector.shape_cast %14 : vector<1x1x128xf32> to vector<1x128xf32>
    %16 = vector.broadcast %15 : vector<1x128xf32> to vector<128x128xf32>
    %17 = arith.addf %13, %16 : vector<128x128xf32>
    %18 = arith.mulf %17, %9 : vector<128x128xf32>
    %cst_15 = arith.constant dense<0xFF800000> : vector<128xf32>
    %19 = vector.multi_reduction <maximumf>, %18, %cst_15 [1] : vector<128x128xf32> to vector<128xf32>
    %20 = vector.shape_cast %19 : vector<128xf32> to vector<128x1xf32>
    %21 = vector.broadcast %20 : vector<128x1xf32> to vector<128x128xf32>
    %22 = arith.subf %18, %21 : vector<128x128xf32>
    %23 = math.exp %22 : vector<128x128xf32>
    %cst_16 = arith.constant dense<0.000000e+00> : vector<128xf32>
    %24 = vector.multi_reduction <add>, %23, %cst_16 [1] : vector<128x128xf32> to vector<128xf32>
    %25 = vector.shape_cast %24 : vector<128xf32> to vector<128x1xf32>
    %26 = tpu.reciprocal %25 {approx = true} : vector<128x1xf32> -> vector<128x1xf32>
    %27 = vector.broadcast %26 : vector<128x1xf32> to vector<128x128xf32>
    %28 = arith.mulf %23, %27 : vector<128x128xf32>
    %29 = arith.extf %0 : vector<128x128xbf16> to vector<128x128xf32>
    %30 = arith.mulf %29, %28 : vector<128x128xf32>
    %31 = arith.truncf %30 : vector<128x128xf32> to vector<128x128xbf16>
    %c0_17 = arith.constant 0 : index
    %c0_18 = arith.constant 0 : index
    %c0_19 = arith.constant 0 : index
    %32 = vector.load %arg6[%c0_17, %c0_18, %c0_19] : memref<3x128x128xbf16, #tpu.memory_space<vmem>>, vector<1x128x128xbf16>
    %33 = vector.shape_cast %32 : vector<1x128x128xbf16> to vector<128x128xbf16>
    %cst_20 = arith.constant dense<0.000000e+00> : vector<128x128xf32>
    %34 = tpu.matmul %31, %33, %cst_20 {dimension_numbers = #tpu.dot_dimension_numbers<[1], [0], [0], [1], [0, 0, 1, 1], [], []>} : vector<128x128xbf16>, vector<128x128xbf16>, vector<128x128xf32> -> vector<128x128xf32>
    %c0_21 = arith.constant 0 : index
    %c0_22 = arith.constant 0 : index
    %c0_23 = arith.constant 0 : index
    %35 = vector.load %arg7[%c0_21, %c0_22, %c0_23] : memref<3x1x128xf32, #tpu.memory_space<vmem>>, vector<1x1x128xf32>
    %36 = vector.shape_cast %35 : vector<1x1x128xf32> to vector<1x128xf32>
    %37 = vector.broadcast %36 : vector<1x128xf32> to vector<128x128xf32>
    %38 = arith.addf %34, %37 : vector<128x128xf32>
    %cst_24 = arith.constant 0.000000e+00 : f32
    %39 = vector.broadcast %cst_24 : f32 to vector<128x128xf32>
    %40 = arith.maximumf %38, %39 : vector<128x128xf32>
    %41 = arith.addf %10, %40 : vector<128x128xf32>
    %cst_25 = arith.constant 1.000000e+00 : f32
    %42 = vector.broadcast %cst_25 : f32 to vector<128x128xf32>
    %43 = arith.subf %42, %28 : vector<128x128xf32>
    %44 = arith.mulf %9, %43 : vector<128x128xf32>
    %c1 = arith.constant 1 : index
    %c0_26 = arith.constant 0 : index
    %c0_27 = arith.constant 0 : index
    %45 = vector.load %arg4[%c1, %c0_26, %c0_27] : memref<3x128x128xbf16, #tpu.memory_space<vmem>>, vector<1x128x128xbf16>
    %46 = vector.shape_cast %45 : vector<1x128x128xbf16> to vector<128x128xbf16>
    %cst_28 = arith.constant dense<0.000000e+00> : vector<128x128xf32>
    %47 = tpu.matmul %8, %46, %cst_28 {dimension_numbers = #tpu.dot_dimension_numbers<[1], [0], [0], [1], [0, 0, 1, 1], [], []>} : vector<128x128xbf16>, vector<128x128xbf16>, vector<128x128xf32> -> vector<128x128xf32>
    %c1_29 = arith.constant 1 : index
    %c0_30 = arith.constant 0 : index
    %c0_31 = arith.constant 0 : index
    %48 = vector.load %arg5[%c1_29, %c0_30, %c0_31] : memref<3x1x128xf32, #tpu.memory_space<vmem>>, vector<1x1x128xf32>
    %49 = vector.shape_cast %48 : vector<1x1x128xf32> to vector<1x128xf32>
    %50 = vector.broadcast %49 : vector<1x128xf32> to vector<128x128xf32>
    %51 = arith.addf %47, %50 : vector<128x128xf32>
    %52 = arith.mulf %51, %44 : vector<128x128xf32>
    %cst_32 = arith.constant dense<0xFF800000> : vector<128xf32>
    %53 = vector.multi_reduction <maximumf>, %52, %cst_32 [1] : vector<128x128xf32> to vector<128xf32>
    %54 = vector.shape_cast %53 : vector<128xf32> to vector<128x1xf32>
    %55 = vector.broadcast %54 : vector<128x1xf32> to vector<128x128xf32>
    %56 = arith.subf %52, %55 : vector<128x128xf32>
    %57 = math.exp %56 : vector<128x128xf32>
    %cst_33 = arith.constant dense<0.000000e+00> : vector<128xf32>
    %58 = vector.multi_reduction <add>, %57, %cst_33 [1] : vector<128x128xf32> to vector<128xf32>
    %59 = vector.shape_cast %58 : vector<128xf32> to vector<128x1xf32>
    %60 = tpu.reciprocal %59 {approx = true} : vector<128x1xf32> -> vector<128x1xf32>
    %61 = vector.broadcast %60 : vector<128x1xf32> to vector<128x128xf32>
    %62 = arith.mulf %57, %61 : vector<128x128xf32>
    %63 = arith.extf %0 : vector<128x128xbf16> to vector<128x128xf32>
    %64 = arith.mulf %63, %62 : vector<128x128xf32>
    %65 = arith.truncf %64 : vector<128x128xf32> to vector<128x128xbf16>
    %c1_34 = arith.constant 1 : index
    %c0_35 = arith.constant 0 : index
    %c0_36 = arith.constant 0 : index
    %66 = vector.load %arg6[%c1_34, %c0_35, %c0_36] : memref<3x128x128xbf16, #tpu.memory_space<vmem>>, vector<1x128x128xbf16>
    %67 = vector.shape_cast %66 : vector<1x128x128xbf16> to vector<128x128xbf16>
    %cst_37 = arith.constant dense<0.000000e+00> : vector<128x128xf32>
    %68 = tpu.matmul %65, %67, %cst_37 {dimension_numbers = #tpu.dot_dimension_numbers<[1], [0], [0], [1], [0, 0, 1, 1], [], []>} : vector<128x128xbf16>, vector<128x128xbf16>, vector<128x128xf32> -> vector<128x128xf32>
    %c1_38 = arith.constant 1 : index
    %c0_39 = arith.constant 0 : index
    %c0_40 = arith.constant 0 : index
    %69 = vector.load %arg7[%c1_38, %c0_39, %c0_40] : memref<3x1x128xf32, #tpu.memory_space<vmem>>, vector<1x1x128xf32>
    %70 = vector.shape_cast %69 : vector<1x1x128xf32> to vector<1x128xf32>
    %71 = vector.broadcast %70 : vector<1x128xf32> to vector<128x128xf32>
    %72 = arith.addf %68, %71 : vector<128x128xf32>
    %cst_41 = arith.constant 0.000000e+00 : f32
    %73 = vector.broadcast %cst_41 : f32 to vector<128x128xf32>
    %74 = arith.maximumf %72, %73 : vector<128x128xf32>
    %75 = arith.addf %41, %74 : vector<128x128xf32>
    %cst_42 = arith.constant 1.000000e+00 : f32
    %76 = vector.broadcast %cst_42 : f32 to vector<128x128xf32>
    %77 = arith.subf %76, %62 : vector<128x128xf32>
    %78 = arith.mulf %44, %77 : vector<128x128xf32>
    %c2 = arith.constant 2 : index
    %c0_43 = arith.constant 0 : index
    %c0_44 = arith.constant 0 : index
    %79 = vector.load %arg4[%c2, %c0_43, %c0_44] : memref<3x128x128xbf16, #tpu.memory_space<vmem>>, vector<1x128x128xbf16>
    %80 = vector.shape_cast %79 : vector<1x128x128xbf16> to vector<128x128xbf16>
    %cst_45 = arith.constant dense<0.000000e+00> : vector<128x128xf32>
    %81 = tpu.matmul %8, %80, %cst_45 {dimension_numbers = #tpu.dot_dimension_numbers<[1], [0], [0], [1], [0, 0, 1, 1], [], []>} : vector<128x128xbf16>, vector<128x128xbf16>, vector<128x128xf32> -> vector<128x128xf32>
    %c2_46 = arith.constant 2 : index
    %c0_47 = arith.constant 0 : index
    %c0_48 = arith.constant 0 : index
    %82 = vector.load %arg5[%c2_46, %c0_47, %c0_48] : memref<3x1x128xf32, #tpu.memory_space<vmem>>, vector<1x1x128xf32>
    %83 = vector.shape_cast %82 : vector<1x1x128xf32> to vector<1x128xf32>
    %84 = vector.broadcast %83 : vector<1x128xf32> to vector<128x128xf32>
    %85 = arith.addf %81, %84 : vector<128x128xf32>
    %86 = arith.mulf %85, %78 : vector<128x128xf32>
    %cst_49 = arith.constant dense<0xFF800000> : vector<128xf32>
    %87 = vector.multi_reduction <maximumf>, %86, %cst_49 [1] : vector<128x128xf32> to vector<128xf32>
    %88 = vector.shape_cast %87 : vector<128xf32> to vector<128x1xf32>
    %89 = vector.broadcast %88 : vector<128x1xf32> to vector<128x128xf32>
    %90 = arith.subf %86, %89 : vector<128x128xf32>
    %91 = math.exp %90 : vector<128x128xf32>
    %cst_50 = arith.constant dense<0.000000e+00> : vector<128xf32>
    %92 = vector.multi_reduction <add>, %91, %cst_50 [1] : vector<128x128xf32> to vector<128xf32>
    %93 = vector.shape_cast %92 : vector<128xf32> to vector<128x1xf32>
    %94 = tpu.reciprocal %93 {approx = true} : vector<128x1xf32> -> vector<128x1xf32>
    %95 = vector.broadcast %94 : vector<128x1xf32> to vector<128x128xf32>
    %96 = arith.mulf %91, %95 : vector<128x128xf32>
    %97 = arith.extf %0 : vector<128x128xbf16> to vector<128x128xf32>
    %98 = arith.mulf %97, %96 : vector<128x128xf32>
    %99 = arith.truncf %98 : vector<128x128xf32> to vector<128x128xbf16>
    %c2_51 = arith.constant 2 : index
    %c0_52 = arith.constant 0 : index
    %c0_53 = arith.constant 0 : index
    %100 = vector.load %arg6[%c2_51, %c0_52, %c0_53] : memref<3x128x128xbf16, #tpu.memory_space<vmem>>, vector<1x128x128xbf16>
    %101 = vector.shape_cast %100 : vector<1x128x128xbf16> to vector<128x128xbf16>
    %cst_54 = arith.constant dense<0.000000e+00> : vector<128x128xf32>
    %102 = tpu.matmul %99, %101, %cst_54 {dimension_numbers = #tpu.dot_dimension_numbers<[1], [0], [0], [1], [0, 0, 1, 1], [], []>} : vector<128x128xbf16>, vector<128x128xbf16>, vector<128x128xf32> -> vector<128x128xf32>
    %c2_55 = arith.constant 2 : index
    %c0_56 = arith.constant 0 : index
    %c0_57 = arith.constant 0 : index
    %103 = vector.load %arg7[%c2_55, %c0_56, %c0_57] : memref<3x1x128xf32, #tpu.memory_space<vmem>>, vector<1x1x128xf32>
    %104 = vector.shape_cast %103 : vector<1x1x128xf32> to vector<1x128xf32>
    %105 = vector.broadcast %104 : vector<1x128xf32> to vector<128x128xf32>
    %106 = arith.addf %102, %105 : vector<128x128xf32>
    %cst_58 = arith.constant 0.000000e+00 : f32
    %107 = vector.broadcast %cst_58 : f32 to vector<128x128xf32>
    %108 = arith.maximumf %106, %107 : vector<128x128xf32>
    %109 = arith.addf %75, %108 : vector<128x128xf32>
    %c0_59 = arith.constant 0 : index
    %c0_60 = arith.constant 0 : index
    %110 = vector.load %arg8[%c0_59, %c0_60] : memref<128x128xf32, #tpu.memory_space<vmem>>, vector<128x128xf32>
    tpu.vector_store %arg8[%c0_59, %c0_60], %109 {strides = array<i32>} : memref<128x128xf32, #tpu.memory_space<vmem>>, vector<128x128xf32>,
    return
  }
  func.func @transform_0(%arg0: i32) -> (i32, i32) {
    %c0_i32 = arith.constant 0 : i32
    %c0_i32_0 = arith.constant 0 : i32
    return %arg0, %c0_i32 : i32, i32
  }
  func.func @transform_1(%arg0: i32) -> (i32, i32) {
    %c0_i32 = arith.constant 0 : i32
    %c0_i32_0 = arith.constant 0 : i32
    %c0_i32_1 = arith.constant 0 : i32
    return %c0_i32, %c0_i32_0 : i32, i32
  }
  func.func @transform_2(%arg0: i32) -> (i32, i32) {
    %c0_i32 = arith.constant 0 : i32
    %c0_i32_0 = arith.constant 0 : i32
    %c0_i32_1 = arith.constant 0 : i32
    return %c0_i32, %c0_i32_0 : i32, i32
  }
  func.func @transform_3(%arg0: i32) -> (i32, i32, i32) {
    %c0_i32 = arith.constant 0 : i32
    %c0_i32_0 = arith.constant 0 : i32
    %c0_i32_1 = arith.constant 0 : i32
    %c0_i32_2 = arith.constant 0 : i32
    return %c0_i32, %c0_i32_0, %c0_i32_1 : i32, i32, i32
  }
  func.func @transform_4(%arg0: i32) -> (i32, i32, i32) {
    %c0_i32 = arith.constant 0 : i32
    %c0_i32_0 = arith.constant 0 : i32
    %c0_i32_1 = arith.constant 0 : i32
    %c0_i32_2 = arith.constant 0 : i32
    return %c0_i32, %c0_i32_0, %c0_i32_1 : i32, i32, i32
  }
  func.func @transform_5(%arg0: i32) -> (i32, i32, i32) {
    %c0_i32 = arith.constant 0 : i32
    %c0_i32_0 = arith.constant 0 : i32
    %c0_i32_1 = arith.constant 0 : i32
    %c0_i32_2 = arith.constant 0 : i32
    return %c0_i32, %c0_i32_0, %c0_i32_1 : i32, i32, i32
  }
  func.func @transform_6(%arg0: i32) -> (i32, i32, i32) {
    %c0_i32 = arith.constant 0 : i32
    %c0_i32_0 = arith.constant 0 : i32
    %c0_i32_1 = arith.constant 0 : i32
    %c0_i32_2 = arith.constant 0 : i32
    return %c0_i32, %c0_i32_0, %c0_i32_1 : i32, i32, i32
  }
  func.func @transform_7(%arg0: i32) -> (i32, i32) {
    %c0_i32 = arith.constant 0 : i32
    %c0_i32_0 = arith.constant 0 : i32
    return %arg0, %c0_i32 : i32, i32
  }
}

</mosaic_0001>

<bundles_post_ra>
// kernel: tabnet_feature_extractor.1
= control target key start
LH: loop header
LB: loop body
LE: loop exit
PB: predicated region body
PF: predicated region fallthrough
CT: control target
= control target key end

     0   :  { %12 = vsyncpa [#allocation3], 0  ;;  %s3223_s24 = smov 0   ;;  %s4445_s0 = inlined_call_operand.vmem [shape: bf16[256,128], index: 0, kind: input, shape index: {}]   ;;  %s4446_s1 = inlined_call_operand.hbm [shape: bf16[128,128], index: 1, kind: input, shape index: {}]   ;;  %s4447_s2 = inlined_call_operand.vmem [shape: f32[1,128], index: 2, kind: input, shape index: {}]   ;;  %s4448_s3 = inlined_call_operand.vmem [shape: bf16[3,128,128], index: 3, kind: input, shape index: {}]   ;;  %s4449_s4 = inlined_call_operand.vmem [shape: f32[3,1,128], index: 4, kind: input, shape index: {}]   ;;  %s4450_s5 = inlined_call_operand.vmem [shape: bf16[3,128,128], index: 5, kind: input, shape index: {}]   ;;  %s4451_s6 = inlined_call_operand.vmem [shape: f32[3,1,128], index: 6, kind: input, shape index: {}]   ;;  %s4452_s7 = inlined_call_operand.vmem [shape: f32[256,128], index: 7, kind: output, shape index: {}]  }
   0x1 LB: > { %s2350_s25 = sadd.s32 4294967295, %s3178_s24   ;;  %p2352_p0 = scmp.ge.s32.totalorder %s3178_s24, 1  ;;  %s3178_s24 = sphi %s3223_s24, %s18_s24  }
   0x2   : > { %p201_p1 = scmp.lt.s32.totalorder %s3178_s24, 3  ;;  %s3180_s26 = smov [#allocation2]  }
   0x3   : > { %s213_s27 = sshll.u32 %s3180_s26, 4  ;;  %p3237_p3 = scmp.eq.s32.totalorder %s2350_s25, 0  ;;  %s214_s27 = int_to_ptr.vmem [resolvable:$true] %s213_s27 }
   0x4   : > { %p3231_p2 = pnand %p2352_p0, %p201_p1  ;;  %s3140_s10 = scalar_lea.hbm %s4446_s1, 1024 }
   0x5   : > { %s4483_s29 = scalar_select %p3237_p3, 1, 0 }
   0x6   : > { %s4482_s28 = scalar_select %p3231_p2, 1, 0 }
   0x7   : > { %p2858_p4 = pneg %p3231_p2  ;;  %p3141_p6 = scmp.ne.s32.totalorder %s4446_s1, %s3140_s10 }
   0x8   : > { %p3147_p10 = scmp.lt.u32.totalorder %s3140_s10, %s4446_s1 }
   0x9   : > { %p3245_p5 = pnand %p3237_p3, %p2858_p4 }
   0xb   : > { %p3142_p7 = pneg %p3245_p5 }
   0xd   : > { %p3143_p8 = pnand %p3142_p7, %p3141_p6 }
   0xf   : > { %p3144_p9 = pneg %p3143_p8 }
  0x11   : > { %p3149_p11 = pnand %p3147_p10, %p3144_p9 }
  0x13   : > { %3152 = shalt.err (!%p3149_p11)
}
  0x14   : > { %s3153_s15 = scalar_lea.vmem %s214_s27, 1024  ;;  %p3161_p1 = scmp.lt.s32.totalorder %s214_s27, %s214_s27 }
  0x15   : > { %p3154_p12 = scmp.ne.s32.totalorder %s214_s27, %s3153_s15  ;;  %p3162_p4 = scmp.lt.s32.totalorder %s3153_s15, %s3153_s15 }
  0x17   : > { %p3156_p13 = pnand %p3154_p12, %p3142_p7  ;;  %p3163_p3 = por %p3162_p4, %p3161_p1 }
  0x19   : > { %p3157_p0 = pneg %p3156_p13 }
  0x1b   : > { %p3164_p2 = pnand %p3163_p3, %p3157_p0 }
  0x1d   : > { %3167 = shalt.err (!%p3164_p2)
}
  0x1e   : > { %s3181_s16 = smov 64   ;;  %s3182_s17 = smov 4  }
  0x1f   : > { %2861 = dma.hbm_to_vmem [thread:$0]  (!%p3245_p5), %s4446_s1, 1024, %s214_s27, [#allocation3], %s3181_s16, %s3181_s16, %s3182_s17  }
  0x20   : > { %p4485_p6 = scmp.ne.s32.totalorder %s4482_s28, 0 }
  0x22   : > { %253 = sbr.rel (%p4485_p6) target bundleno = 1722 (0x6ba), region = 48 }
  0x29   : > { %p4486_p8 = scmp.ne.s32.totalorder %s4483_s29, 0 }
  0x2b   : > { %3173 = dma.done.wait (%p4486_p8), [#allocation3], 1024  }
  0x2c   : > { %3175 = vsyncadd (%p4486_p8), [#allocation3], 4294966272  ;;  %s2357_s20 = sshll.u32 %s2350_s25, 4  ;;  %v2875_v0 = vld [vmem:[#allocation2] sm:$0xff]   ;;  %v2876_v1 = vld [vmem:[#allocation2 + $0x8] sm:$0xff]  }
  0x2d   : > { %p286_p2 = scmp.lt.s32.totalorder %s2357_s20, 31  ;;  %2614 = vmatprep.subr.bf16.mxu0 %v2875_v0  ;;  %v2877_v2 = vld [vmem:[#allocation2 + $0x10] sm:$0xff]   ;;  %v2878_v3 = vld [vmem:[#allocation2 + $0x18] sm:$0xff]   ;;  %v2879_v5 = vld [vmem:[#allocation2 + $0x20] sm:$0xff]  }
  0x2e   : > { %2615 = vmatpush3.bf16.msra.mxu0 %v2875_v0  ;;  %v2891_v6 = vld [vmem:[%s4448_s3] sm:$0xff]   ;;  %v2892_v7 = vld [vmem:[%s4448_s3 + $0x8] sm:$0xff]   ;;  %v2893_v8 = vld [vmem:[%s4448_s3 + $0x10] sm:$0xff]  }
  0x2f   : > { %s4572_s20 = smov (!%p286_p2, %s2357_s20), 31  ;;  %2616 = vmatprep.subr.bf16.mxu0 %v2876_v1  ;;  %2646 = vmatprep.subr.bf16.mxu1 %v2891_v6  ;;  %v2880_v9 = vld [vmem:[#allocation2 + $0x28] sm:$0xff]   ;;  %v2894_v10 = vld [vmem:[%s4448_s3 + $0x18] sm:$0xff]   ;;  %v2881_v11 = vld [vmem:[#allocation2 + $0x30] sm:$0xff]  }
  0x30   : > { %s2358_s21 = sshll.u32 %s4572_s20, 2  ;;  %2647 = vmatpush3.bf16.msra.mxu1 %v2891_v6  ;;  %v2895_v12 = vld [vmem:[%s4448_s3 + $0x20] sm:$0xff]   ;;  %v2882_v13 = vld [vmem:[#allocation2 + $0x38] sm:$0xff]   ;;  %v2896_v15 = vld [vmem:[%s4448_s3 + $0x28] sm:$0xff]   ;;  %s2360_s11 = sshll.u32 %s4572_s20, 3 }
  0x31   : > { %s3279_s26 = scalar_lea.vmem %s4445_s0, %s2358_s21  ;;  %2648 = vmatprep.subr.bf16.mxu1 %v2892_v7  ;;  %v2897_v22 = vld [vmem:[%s4448_s3 + $0x30] sm:$0xff]   ;;  %v2898_v23 = vld [vmem:[%s4448_s3 + $0x38] sm:$0xff]   ;;  %v2899_v24 = vld [vmem:[%s4448_s3 + $0x40] sm:$0xff]   ;;  %s4395_s13 = scalar_lea.vmem %s4452_s7, %s2360_s11 }
  0x32   : > { %2617 = vmatpush3.bf16.msra.mxu0 %v2876_v1  ;;  %v298_v4 = vld [vmem:[%s3279_s26] sm:$0xff]   ;;  %v3298_v14 = vld [vmem:[%s3279_s26 + $0x8] sm:$0xff]   ;;  %v3304_v16 = vld [vmem:[%s3279_s26 + $0x10] sm:$0xff]  }
  0x33   : > { %2618 = vmatprep.subr.bf16.mxu0 %v2877_v2  ;;  %2630 = vmatprep.mubr.bf16.mxu0 %v298_v4  ;;  %v3307_v17 = vld [vmem:[%s3279_s26 + $0x18] sm:$0xff]   ;;  %v3311_v18 = vld [vmem:[%s3279_s26 + $0x20] sm:$0xff]   ;;  %v3315_v19 = vld [vmem:[%s3279_s26 + $0x28] sm:$0xff]  }
  0x34   : > { %2649 = vmatpush3.bf16.msra.mxu1 %v2892_v7  ;;  %v3320_v20 = vld [vmem:[%s3279_s26 + $0x30] sm:$0xff]   ;;  %v3325_v21 = vld [vmem:[%s3279_s26 + $0x38] sm:$0xff]   ;;  %v3340_v25 = vld [vmem:[%s4447_s2] ss:$0 sm:$0xff] }
  0x35   : > { %2650 = vmatprep.subr.bf16.mxu1 %v2893_v8  ;;  %v2900_v43 = vld [vmem:[%s4448_s3 + $0x48] sm:$0xff]   ;;  %v2901_v51 = vld [vmem:[%s4448_s3 + $0x50] sm:$0xff]   ;;  %v2902_v59 = vld [vmem:[%s4448_s3 + $0x58] sm:$0xff]  }
  0x36   : > { %2619 = vmatpush3.bf16.msra.mxu0 %v2877_v2 }
  0x37   : > { %2620 = vmatprep.subr.bf16.mxu0 %v2878_v3 }
  0x38   : > { %2651 = vmatpush3.bf16.msra.mxu1 %v2893_v8 }
  0x39   : > { %2652 = vmatprep.subr.bf16.mxu1 %v2894_v10 }
  0x3a   : > { %2621 = vmatpush3.bf16.msra.mxu0 %v2878_v3  ;;  %v2903_v3 = vld [vmem:[%s4448_s3 + $0x60] sm:$0xff]  }
  0x3b   : > { %2622 = vmatprep.subr.bf16.mxu0 %v2879_v5 }
  0x3c   : > { %2653 = vmatpush3.bf16.msra.mxu1 %v2894_v10 }
  0x3d   : > { %2654 = vmatprep.subr.bf16.mxu1 %v2895_v12 }
  0x3e   : > { %2623 = vmatpush3.bf16.msra.mxu0 %v2879_v5 }
  0x3f   : > { %2624 = vmatprep.subr.bf16.mxu0 %v2880_v9 }
  0x40   : > { %2655 = vmatpush3.bf16.msra.mxu1 %v2895_v12 }
  0x41   : > { %2656 = vmatprep.subr.bf16.mxu1 %v2896_v15 }
  0x42   : > { %2625 = vmatpush3.bf16.msra.mxu0 %v2880_v9 }
  0x43   : > { %2626 = vmatprep.subr.bf16.mxu0 %v2881_v11 }
  0x44   : > { %2657 = vmatpush3.bf16.msra.mxu1 %v2896_v15 }
  0x45   : > { %2658 = vmatprep.subr.bf16.mxu1 %v2897_v22 }
  0x46   : > { %2627 = vmatpush3.bf16.msra.mxu0 %v2881_v11  ;;  %v2904_v11 = vld [vmem:[%s4448_s3 + $0x68] sm:$0xff]  }
  0x47   : > { %2628 = vmatprep.subr.bf16.mxu0 %v2882_v13 }
  0x48   : > { %2659 = vmatpush3.bf16.msra.mxu1 %v2897_v22 }
  0x49   : > { %2660 = vmatprep.subr.bf16.mxu1 %v2898_v23 }
  0x4a   : > { %2629 = vmatpush3.bf16.msra.mxu0 %v2882_v13 }
  0x4c   : > { %2661 = vmatpush3.bf16.msra.mxu1 %v2898_v23 }
  0x4d   : > { %2631 = vmatmul.mubr.bf16.vlgmr.msra.gmra.mrb[0].mxu0 %v3298_v14  ;;  %2710 = vmatprep.subr.bf16.mxu1 %v2899_v24 }
  0x4e   : > { %2634 = vmatprep.mubr.bf16.mxu0 %v3304_v16 }
  0x55   : > { %2635 = vmatmul.mubr.bf16.gmra.mrb[4].mxu0 %v3307_v17 }
  0x56   : > { %2638 = vmatprep.mubr.bf16.mxu0 %v3311_v18 }
  0x5d   : > { %2639 = vmatmul.mubr.bf16.gmra.mrb[8].mxu0 %v3315_v19 }
  0x5e   : > { %2642 = vmatprep.mubr.bf16.mxu0 %v3320_v20 }
  0x65   : > { %2643 = vmatmul.mubr.bf16.gmra.mrb[12].mxu0 %v3325_v21 }
 0x120   : > { %v2632_v26 = vpop.f32.mrb[0].mxu0 }
 0x121   : > { %v476_v27 = vadd.f32 %v2632_v26, %v3340_v25  ;;  %v467_v28 = vpop.f32.mrb[1].mxu0 }
 0x122   : > { %v468_v29 = vadd.f32 %v3340_v25, %v467_v28  ;;  %v2633_v30 = vpop.f32.mrb[2].mxu0  ;;  %v2905_v28 = vld [vmem:[%s4448_s3 + $0x70] sm:$0xff]  }
 0x123   : > { %v479_v31 = vadd.f32 %v2633_v30, %v3340_v25  ;;  %v470_v32 = vpop.f32.mrb[3].mxu0  ;;  %v532_v34 = vmax.f32 %v476_v27, 0.0 }
 0x124   : > { %v471_v33 = vadd.f32 %v3340_v25, %v470_v32  ;;  %v530_v36 = vmax.f32 %v468_v29, 0.0  ;;  %v2906_v32 = vld [vmem:[%s4448_s3 + $0x78] sm:$0xff]  }
 0x125   : > { %v533_v35 = vmax.f32 %v479_v31, 0.0 }
 0x126   : > { %v531_v37 = vmax.f32 %v471_v33, 0.0  ;;  %v2908_v33 = vld [vmem:[%s4448_s3 + $0x88] sm:$0xff]  }
 0x127   : > { %v3346_v38 = vpack.c.bf16 %v533_v35, %v532_v34  ;;  %v2909_v34 = vld [vmem:[%s4448_s3 + $0x90] sm:$0xff]   ;;  %v2910_v35 = vld [vmem:[%s4448_s3 + $0x98] sm:$0xff]  }
 0x128   : > { %v3348_v39 = vpack.c.bf16 %v531_v37, %v530_v36  ;;  %v2636_v40 = vpop.f32.mrb[4].mxu0  ;;  %v2911_v36 = vld [vmem:[%s4448_s3 + $0xa0] sm:$0xff]   ;;  %v2912_v37 = vld [vmem:[%s4448_s3 + $0xa8] sm:$0xff]  }
 0x129   : > { %v492_v41 = vadd.f32 %v2636_v40, %v3340_v25  ;;  %v483_v42 = vpop.f32.mrb[5].mxu0  ;;  %v2913_v40 = vld [vmem:[%s4448_s3 + $0xb0] sm:$0xff]  }
 0x12a   : > { %v484_v44 = vadd.f32 %v3340_v25, %v483_v42  ;;  %v2637_v45 = vpop.f32.mrb[6].mxu0  ;;  %2662 = vmatprep.mubr.bf16.mxu1 %v3348_v39  ;;  %v2378_v42 = vld [vmem:[%s4449_s4] ss:$0 sm:$0xff] }
 0x12b   : > { %v495_v46 = vadd.f32 %v2637_v45, %v3340_v25  ;;  %v486_v47 = vpop.f32.mrb[7].mxu0  ;;  %2663 = vmatmul.mubr.bf16.vlgmr.msra.gmra.mrb[0].mxu1 %v3346_v38  ;;  %v536_v49 = vmax.f32 %v492_v41, 0.0  ;;  %v2914_v41 = vld [vmem:[%s4448_s3 + $0xb8] sm:$0xff]  }
 0x12c   : > { %v487_v48 = vadd.f32 %v3340_v25, %v486_v47  ;;  %2711 = vmatpush3.bf16.msra.mxu1 %v2899_v24  ;;  %v534_v52 = vmax.f32 %v484_v44, 0.0 }
 0x12d   : > { %v537_v50 = vmax.f32 %v495_v46, 0.0  ;;  %2712 = vmatprep.subr.bf16.mxu1 %v2900_v43 }
 0x12e   : > { %v535_v53 = vmax.f32 %v487_v48, 0.0 }
 0x12f   : > { %v3362_v54 = vpack.c.bf16 %v537_v50, %v536_v49 }
 0x130   : > { %v3364_v55 = vpack.c.bf16 %v535_v53, %v534_v52  ;;  %v2640_v56 = vpop.f32.mrb[8].mxu0  ;;  %2713 = vmatpush3.bf16.msra.mxu1 %v2900_v43 }
 0x131   : > { %v508_v57 = vadd.f32 %v2640_v56, %v3340_v25  ;;  %v499_v58 = vpop.f32.mrb[9].mxu0  ;;  %2714 = vmatprep.subr.bf16.mxu1 %v2901_v51 }
 0x132   : > { %v500_v60 = vadd.f32 %v3340_v25, %v499_v58  ;;  %v2641_v61 = vpop.f32.mrb[10].mxu0  ;;  %2666 = vmatprep.mubr.bf16.mxu1 %v3364_v55 }
 0x133   : > { %v511_v62 = vadd.f32 %v2641_v61, %v3340_v25  ;;  %v502_v63 = vpop.f32.mrb[11].mxu0  ;;  %2667 = vmatmul.mubr.bf16.gmra.mrb[4].mxu1 %v3362_v54  ;;  %v540_v1 = vmax.f32 %v508_v57, 0.0 }
 0x134   : > { %v503_v0 = vadd.f32 %v3340_v25, %v502_v63  ;;  %2715 = vmatpush3.bf16.msra.mxu1 %v2901_v51  ;;  %v538_v4 = vmax.f32 %v500_v60, 0.0 }
 0x135   : > { %v541_v2 = vmax.f32 %v511_v62, 0.0  ;;  %2716 = vmatprep.subr.bf16.mxu1 %v2902_v59 }
 0x136   : > { %v539_v5 = vmax.f32 %v503_v0, 0.0 }
 0x137   : > { %v3378_v6 = vpack.c.bf16 %v541_v2, %v540_v1 }
 0x138   : > { %v3380_v7 = vpack.c.bf16 %v539_v5, %v538_v4  ;;  %v2644_v8 = vpop.f32.mrb[12].mxu0  ;;  %2717 = vmatpush3.bf16.msra.mxu1 %v2902_v59 }
 0x139   : > { %v524_v9 = vadd.f32 %v2644_v8, %v3340_v25  ;;  %v515_v10 = vpop.f32.mrb[13].mxu0  ;;  %2718 = vmatprep.subr.bf16.mxu1 %v2903_v3 }
 0x13a   : > { %v516_v12 = vadd.f32 %v3340_v25, %v515_v10  ;;  %v2645_v13 = vpop.f32.mrb[14].mxu0  ;;  %2670 = vmatprep.mubr.bf16.mxu1 %v3380_v7 }
 0x13b   : > { %v544_v15 = vmax.f32 %v524_v9, 0.0  ;;  %v527_v22 = vadd.f32 %v2645_v13, %v3340_v25  ;;  %v518_v23 = vpop.f32.mrb[15].mxu0  ;;  %2671 = vmatmul.mubr.bf16.gmra.mrb[8].mxu1 %v3378_v6 }
 0x13c   : > { %v542_v24 = vmax.f32 %v516_v12, 0.0  ;;  %v519_v26 = vadd.f32 %v3340_v25, %v518_v23  ;;  %2719 = vmatpush3.bf16.msra.mxu1 %v2903_v3  ;;  %v2907_v25 = vld [vmem:[%s4448_s3 + $0x80] sm:$0xff]  }
 0x13d   : > { %v545_v27 = vmax.f32 %v527_v22, 0.0  ;;  %2720 = vmatprep.subr.bf16.mxu1 %v2904_v11 }
 0x13e   : > { %v543_v29 = vmax.f32 %v519_v26, 0.0 }
 0x13f   : > { %v553_v30 = vpack.c.bf16 %v545_v27, %v544_v15 }
 0x140   : > { %v552_v31 = vpack.c.bf16 %v543_v29, %v542_v24  ;;  %2721 = vmatpush3.bf16.msra.mxu1 %v2904_v11 }
 0x141   : > { %2722 = vmatprep.subr.bf16.mxu1 %v2905_v28 }
 0x142   : > { %2674 = vmatprep.mubr.bf16.mxu1 %v552_v31 }
 0x143   : > { %2675 = vmatmul.mubr.bf16.gmra.mrb[12].mxu1 %v553_v30 }
 0x144   : > { %2723 = vmatpush3.bf16.msra.mxu1 %v2905_v28  ;;  %2726 = vmatprep.mubr.bf16.mxu1 %v3348_v39 }
 0x145   : > { %2724 = vmatprep.subr.bf16.mxu1 %v2906_v32 }
 0x148   : > { %2725 = vmatpush3.bf16.msra.mxu1 %v2906_v32 }
 0x149   : > { %2774 = vmatprep.subr.bf16.mxu1 %v2907_v25 }
 0x14b   : > { %2727 = vmatmul.mubr.bf16.vlgmr.msra.gmra.mrb[16].mxu1 %v3346_v38 }
 0x14c   : > { %2730 = vmatprep.mubr.bf16.mxu1 %v3364_v55  ;;  %2775 = vmatpush3.bf16.msra.mxu1 %v2907_v25 }
 0x14d   : > { %2776 = vmatprep.subr.bf16.mxu1 %v2908_v33 }
 0x150   : > { %2777 = vmatpush3.bf16.msra.mxu1 %v2908_v33 }
 0x151   : > { %2778 = vmatprep.subr.bf16.mxu1 %v2909_v34 }
 0x153   : > { %2731 = vmatmul.mubr.bf16.gmra.mrb[20].mxu1 %v3362_v54 }
 0x154   : > { %2734 = vmatprep.mubr.bf16.mxu1 %v3380_v7  ;;  %2779 = vmatpush3.bf16.msra.mxu1 %v2909_v34 }
 0x155   : > { %2780 = vmatprep.subr.bf16.mxu1 %v2910_v35 }
 0x158   : > { %2781 = vmatpush3.bf16.msra.mxu1 %v2910_v35 }
 0x159   : > { %2782 = vmatprep.subr.bf16.mxu1 %v2911_v36 }
 0x15b   : > { %2735 = vmatmul.mubr.bf16.gmra.mrb[24].mxu1 %v3378_v6 }
 0x15c   : > { %2738 = vmatprep.mubr.bf16.mxu1 %v552_v31  ;;  %2783 = vmatpush3.bf16.msra.mxu1 %v2911_v36  ;;  %v2915_v36 = vld [vmem:[%s4450_s5] sm:$0xff]  }
 0x15d   : > { %2784 = vmatprep.subr.bf16.mxu1 %v2912_v37  ;;  %2678 = vmatprep.subr.bf16.mxu0 %v2915_v36 }
 0x15e   : > { %2679 = vmatpush3.bf16.msra.mxu0 %v2915_v36 }
 0x160   : > { %2785 = vmatpush3.bf16.msra.mxu1 %v2912_v37  ;;  %v2916_v37 = vld [vmem:[%s4450_s5 + $0x8] sm:$0xff]  }
 0x161   : > { %2786 = vmatprep.subr.bf16.mxu1 %v2913_v40  ;;  %2680 = vmatprep.subr.bf16.mxu0 %v2916_v37 }
 0x162   : > { %2681 = vmatpush3.bf16.msra.mxu0 %v2916_v37 }
 0x163   : > { %2739 = vmatmul.mubr.bf16.gmra.mrb[28].mxu1 %v553_v30 }
 0x164   : > { %2787 = vmatpush3.bf16.msra.mxu1 %v2913_v40  ;;  %2790 = vmatprep.mubr.bf16.mxu1 %v3348_v39 }
 0x165   : > { %2788 = vmatprep.subr.bf16.mxu1 %v2914_v41 }
 0x168   : > { %2789 = vmatpush3.bf16.msra.mxu1 %v2914_v41 }
 0x16b   : > { %2791 = vmatmul.mubr.bf16.vlgmr.msra.gmra.mrb[32].mxu1 %v3346_v38 }
 0x16c   : > { %2794 = vmatprep.mubr.bf16.mxu1 %v3364_v55 }
 0x173   : > { %2795 = vmatmul.mubr.bf16.gmra.mrb[36].mxu1 %v3362_v54 }
 0x174   : > { %2798 = vmatprep.mubr.bf16.mxu1 %v3380_v7 }
 0x17b   : > { %2799 = vmatmul.mubr.bf16.gmra.mrb[40].mxu1 %v3378_v6 }
 0x17c   : > { %2802 = vmatprep.mubr.bf16.mxu1 %v552_v31 }
 0x183   : > { %2803 = vmatmul.mubr.bf16.gmra.mrb[44].mxu1 %v553_v30 }
 0x1fe   : > { %v2664_v43 = vpop.f32.mrb[0].mxu1 }
 0x1ff   : > { %v3436_v39 = vadd.f32 %v2664_v43, %v2378_v42  ;;  %v659_v44 = vpop.f32.mrb[1].mxu1 }
 0x200   : > { %v2665_v45 = vpop.f32.mrb[2].mxu1  ;;  %v3441_v47 = vadd.f32 %v2378_v42, %v659_v44 }
 0x201   : > { %v3438_v38 = vadd.f32 %v2665_v45, %v2378_v42  ;;  %726 = vmax.xlane.f32.xlu0 %v3436_v39  ;;  %v662_v46 = vpop.f32.mrb[3].mxu1 }
 0x202   : > { %v3445_v49 = vadd.f32 %v2378_v42, %v662_v46 }
 0x203   : > { %728 = vmax.xlane.f32.xlu1 %v3438_v38 }
 0x205   : > { %722 = vmax.xlane.f32.xlu0 %v3441_v47 }
 0x206   : > { %v2668_v48 = vpop.f32.mrb[4].mxu1 }
 0x207   : > { %v675_v50 = vpop.f32.mrb[5].mxu1  ;;  %v3450_v54 = vadd.f32 %v2668_v48, %v2378_v42 }
 0x208   : > { %v2669_v51 = vpop.f32.mrb[6].mxu1  ;;  %v3454_v56 = vadd.f32 %v2378_v42, %v675_v50 }
 0x209   : > { %v678_v52 = vpop.f32.mrb[7].mxu1  ;;  %724 = vmax.xlane.f32.xlu0 %v3445_v49  ;;  %v3472_v5 = vadd.f32 %v2669_v51, %v2378_v42 }
 0x20a   : > { %v3448_v53 = vadd.f32 %v2378_v42, %v678_v52 }
 0x20c   : > { %732 = vmax.xlane.f32.xlu1 %v3448_v53 }
 0x20d   : > { %734 = vmax.xlane.f32.xlu0 %v3450_v54 }
 0x20e   : > { %v2672_v55 = vpop.f32.mrb[8].mxu1 }
 0x20f   : > { %v691_v57 = vpop.f32.mrb[9].mxu1  ;;  %v3460_v61 = vadd.f32 %v2672_v55, %v2378_v42 }
 0x210   : > { %v3456_v58 = vadd.f32 %v2378_v42, %v691_v57  ;;  %v2673_v59 = vpop.f32.mrb[10].mxu1 }
 0x211   : > { %v694_v60 = vpop.f32.mrb[11].mxu1  ;;  %730 = vmax.xlane.f32.xlu0 %v3454_v56  ;;  %v3462_v62 = vadd.f32 %v2673_v59, %v2378_v42 }
 0x212   : > { %738 = vmax.xlane.f32.xlu1 %v3456_v58  ;;  %v3466_v1 = vadd.f32 %v2378_v42, %v694_v60 }
 0x215   : > { %742 = vmax.xlane.f32.xlu0 %v3460_v61 }
 0x216   : > { %v2676_v63 = vpop.f32.mrb[12].mxu1  ;;  %744 = vmax.xlane.f32.xlu1 %v3462_v62 }
 0x217   : > { %v707_v0 = vpop.f32.mrb[13].mxu1  ;;  %v3474_v6 = vadd.f32 %v2676_v63, %v2378_v42 }
 0x218   : > { %v3468_v2 = vadd.f32 %v2378_v42, %v707_v0  ;;  %v2677_v3 = vpop.f32.mrb[14].mxu1 }
 0x219   : > { %v710_v4 = vpop.f32.mrb[15].mxu1  ;;  %v3489_v12 = vadd.f32 %v2677_v3, %v2378_v42 }
 0x21a   : > { %740 = vmax.xlane.f32.xlu1 %v3466_v1  ;;  %746 = vmax.xlane.f32.xlu0 %v3468_v2  ;;  %v3482_v9 = vadd.f32 %v2378_v42, %v710_v4 }
 0x21e   : > { %v3476_v7 = vpop.f32.mrb[16].mxu1  ;;  %736 = vmax.xlane.f32.xlu1 %v3472_v5  ;;  %750 = vmax.xlane.f32.xlu0 %v3474_v6 }
 0x21f   : > { %v3480_v8 = vpop.f32.mrb[17].mxu1 }
 0x220   : > { %v3484_v10 = vpop.f32.mrb[18].mxu1 }
 0x221   : > { %v3486_v11 = vpop.f32.mrb[19].mxu1 }
 0x222   : > { %748 = vmax.xlane.f32.xlu1 %v3482_v9 }
 0x226   : > { %v3491_v13 = vpop.f32.mrb[20].mxu1  ;;  %752 = vmax.xlane.f32.xlu1 %v3489_v12 }
 0x227   : > { %v3494_v15 = vpop.f32.mrb[21].mxu1 }
 0x228   : > { %v3496_v22 = vpop.f32.mrb[22].mxu1 }
 0x229   : > { %v3498_v23 = vpop.f32.mrb[23].mxu1 }
 0x22e   : > { %v3500_v24 = vpop.f32.mrb[24].mxu1 }
 0x22f   : > { %v3502_v26 = vpop.f32.mrb[25].mxu1 }
 0x230   : > { %v3504_v27 = vpop.f32.mrb[26].mxu1 }
 0x231   : > { %v3506_v28 = vpop.f32.mrb[27].mxu1 }
 0x236   : > { %v3508_v29 = vpop.f32.mrb[28].mxu1 }
 0x237   : > { %v3510_v30 = vpop.f32.mrb[29].mxu1 }
 0x238   : > { %v3512_v31 = vpop.f32.mrb[30].mxu1 }
 0x239   : > { %v3514_v32 = vpop.f32.mrb[31].mxu1 }
 0x23e   : > { %v3516_v25 = vpop.f32.mrb[32].mxu1 }
 0x23f   : > { %v3518_v33 = vpop.f32.mrb[33].mxu1 }
 0x240   : > { %v3520_v34 = vpop.f32.mrb[34].mxu1 }
 0x241   : > { %v3522_v35 = vpop.f32.mrb[35].mxu1 }
 0x246   : > { %v3530_v40 = vpop.f32.mrb[36].mxu1 }
 0x247   : > { %4487 = vst [vmem:[#allocation5_spill] sm:$0xff] %v3530_v40  ;;  %v3532_v41 = vpop.f32.mrb[37].mxu1  ;;  %v3707_v40 = vunpack.c.l.bf16 %v3304_v16 }
 0x248   : > { %v3534_v42 = vpop.f32.mrb[38].mxu1 }
 0x249   : > { %4488 = vst [vmem:[#allocation6_spill] sm:$0xff] %v3534_v42  ;;  %v3536_v43 = vpop.f32.mrb[39].mxu1 }
 0x24e   : > { %v3538_v44 = vpop.f32.mrb[40].mxu1 }
 0x24f   : > { %4489 = vst [vmem:[#allocation7_spill] sm:$0xff] %v3538_v44  ;;  %v3540_v45 = vpop.f32.mrb[41].mxu1 }
 0x250   : > { %4490 = vst [vmem:[#allocation8_spill] sm:$0xff] %v3540_v45  ;;  %v3542_v46 = vpop.f32.mrb[42].mxu1 }
 0x251   : > { %4491 = vst [vmem:[#allocation9_spill] sm:$0xff] %v3542_v46  ;;  %v3544_v48 = vpop.f32.mrb[43].mxu1  ;;  %v3710_v46 = vunpack.c.h.bf16 %v3304_v16 }
 0x252   : > { %4492 = vst [vmem:[#allocation10_spill] sm:$0xff] %v3544_v48 }
 0x256   : > { %v3546_v50 = vpop.f32.mrb[44].mxu1 }
 0x257   : > { %4493 = vst [vmem:[#allocation11_spill] sm:$0xff] %v3546_v50  ;;  %v3548_v51 = vpop.f32.mrb[45].mxu1 }
 0x258   : > { %4494 = vst [vmem:[#allocation12_spill] sm:$0xff] %v3548_v51  ;;  %v3550_v52 = vpop.f32.mrb[46].mxu1 }
 0x259   : > { %4495 = vst [vmem:[#allocation13_spill] sm:$0xff] %v3550_v52  ;;  %v3552_v55 = vpop.f32.mrb[47].mxu1 }
 0x25a   : > { %4496 = vst [vmem:[#allocation14_spill] sm:$0xff] %v3552_v55 }
 0x28e   : > { %v727_v57 = vpop.xlane.xlu0 %726 }
 0x28f   : > { %v756_v59 = vsub.f32 %v3436_v39, %v727_v57 }
 0x290   : > { %v729_v60 = vpop.xlane.xlu1 %728 }
 0x291   : > { %v774_v63 = vmul.f32 1.442695, %v756_v59  ;;  %v757_v0 = vsub.f32 %v3438_v38, %v729_v60 }
 0x292   : > { %v723_v3 = vpop.xlane.xlu0 %722 }
 0x293   : > { %2947 = vpow2.f32 %v774_v63  ;;  %v776_v4 = vmul.f32 1.442695, %v757_v0  ;;  %v754_v36 = vsub.f32 %v3441_v47, %v723_v3 }
 0x295   : > { %2949 = vpow2.f32 %v776_v4  ;;  %v770_v37 = vmul.f32 1.442695, %v754_v36 }
 0x296   : > { %v725_v50 = vpop.xlane.xlu0 %724 }
 0x297   : > { %2951 = vpow2.f32 %v770_v37  ;;  %v755_v52 = vsub.f32 %v3445_v49, %v725_v50 }
 0x299   : > { %v772_v51 = vmul.f32 1.442695, %v755_v52  ;;  %v733_v55 = vpop.xlane.xlu1 %732 }
 0x29a   : > { %v759_v42 = vsub.f32 %v3448_v53, %v733_v55  ;;  %v735_v39 = vpop.xlane.xlu0 %734 }
 0x29b   : > { %2953 = vpow2.f32 %v772_v51  ;;  %v760_v4 = vsub.f32 %v3450_v54, %v735_v39 }
 0x29c   : > { %v780_v57 = vmul.f32 1.442695, %v759_v42 }
 0x29d   : > { %v3559_v59 = vpop.eup %2947 }
 0x29e   : > { %2955 = vpow2.f32 %v780_v57  ;;  %806 = vadd.xlane.f32.xlu0 %v3559_v59  ;;  %v731_v38 = vpop.xlane.xlu0 %730 }
 0x29f   : > { %v3562_v47 = vpop.eup %2949  ;;  %v758_v60 = vsub.f32 %v3454_v56, %v731_v38  ;;  %v739_v63 = vpop.xlane.xlu1 %738 }
 0x2a0   : > { %808 = vadd.xlane.f32.xlu1 %v3562_v47  ;;  %v762_v42 = vsub.f32 %v3456_v58, %v739_v63 }
 0x2a1   : > { %v3566_v49 = vpop.eup %2951  ;;  %v778_v50 = vmul.f32 1.442695, %v758_v60 }
 0x2a2   : > { %802 = vadd.xlane.f32.xlu0 %v3566_v49  ;;  %v743_v53 = vpop.xlane.xlu0 %742  ;;  %v786_v36 = vmul.f32 1.442695, %v762_v42 }
 0x2a3   : > { %2957 = vpow2.f32 %v778_v50  ;;  %v764_v51 = vsub.f32 %v3460_v61, %v743_v53  ;;  %v745_v52 = vpop.xlane.xlu1 %744  ;;  %v2917_v53 = vld [vmem:[%s4450_s5 + $0x10] sm:$0xff]  }
 0x2a4   : > { %v765_v55 = vsub.f32 %v3462_v62, %v745_v52  ;;  %v782_v62 = vmul.f32 1.442695, %v760_v4  ;;  %2682 = vmatprep.subr.bf16.mxu0 %v2917_v53 }
 0x2a5   : > { %v3572_v0 = vpop.eup %2953  ;;  %v790_v56 = vmul.f32 1.442695, %v764_v51  ;;  %2683 = vmatpush3.bf16.msra.mxu0 %v2917_v53  ;;  %v2922_v53 = vld [vmem:[%s4450_s5 + $0x38] sm:$0xff]  }
 0x2a6   : > { %v792_v3 = vmul.f32 1.442695, %v765_v55  ;;  %804 = vadd.xlane.f32.xlu1 %v3572_v0 }
 0x2a7   : > { %2959 = vpow2.f32 %v790_v56  ;;  %v741_v37 = vpop.xlane.xlu1 %740  ;;  %v747_v57 = vpop.xlane.xlu0 %746 }
 0x2a8   : > { %v3576_v38 = vpop.eup %2955  ;;  %2961 = vpow2.f32 %v792_v3  ;;  %v763_v58 = vsub.f32 %v3466_v1, %v741_v37  ;;  %v766_v60 = vsub.f32 %v3468_v2, %v747_v57 }
 0x2a9   : > { %2963 = vpow2.f32 %v786_v36  ;;  %v2919_v36 = vld [vmem:[%s4450_s5 + $0x20] sm:$0xff]  }
 0x2aa   : > { %v788_v61 = vmul.f32 1.442695, %v763_v58  ;;  %812 = vadd.xlane.f32.xlu1 %v3576_v38  ;;  %v794_v1 = vmul.f32 1.442695, %v766_v60 }
 0x2ab   : > { %v737_v63 = vpop.xlane.xlu1 %736  ;;  %v751_v39 = vpop.xlane.xlu0 %750 }
 0x2ac   : > { %2965 = vpow2.f32 %v788_v61  ;;  %v761_v54 = vsub.f32 %v3472_v5, %v737_v63  ;;  %v768_v51 = vsub.f32 %v3474_v6, %v751_v39  ;;  %v2918_v5 = vld [vmem:[%s4450_s5 + $0x18] sm:$0xff]   ;;  %v2921_v63 = vld [vmem:[%s4450_s5 + $0x30] sm:$0xff]  }
 0x2ad   : > { %v3582_v50 = vpop.eup %2957  ;;  %2967 = vpow2.f32 %v782_v62  ;;  %2684 = vmatprep.subr.bf16.mxu0 %v2918_v5 }
 0x2ae   : > { %v784_v42 = vmul.f32 1.442695, %v761_v54  ;;  %810 = vadd.xlane.f32.xlu0 %v3582_v50  ;;  %v798_v6 = vmul.f32 1.442695, %v768_v51  ;;  %2685 = vmatpush3.bf16.msra.mxu0 %v2918_v5 }
 0x2af   : > { %v749_v52 = vpop.xlane.xlu1 %748  ;;  %2686 = vmatprep.subr.bf16.mxu0 %v2919_v36 }
 0x2b0   : > { %2969 = vpow2.f32 %v784_v42  ;;  %v767_v2 = vsub.f32 %v3482_v9, %v749_v52 }
 0x2b1   : > { %v3593_v55 = vpop.eup %2959  ;;  %2971 = vpow2.f32 %v794_v1 }
 0x2b2   : > { %v3595_v56 = vpop.eup %2961  ;;  %v796_v3 = vmul.f32 1.442695, %v767_v2  ;;  %822 = vadd.xlane.f32.xlu0 %v3593_v55  ;;  %2687 = vmatpush3.bf16.msra.mxu0 %v2919_v36 }
 0x2b3   : > { %v753_v4 = vpop.xlane.xlu1 %752  ;;  %824 = vadd.xlane.f32.xlu1 %v3595_v56  ;;  %v3603_v37 = vpop.eup %2963 }
 0x2b4   : > { %2973 = vpow2.f32 %v796_v3  ;;  %v769_v9 = vsub.f32 %v3489_v12, %v753_v4  ;;  %v2920_v12 = vld [vmem:[%s4450_s5 + $0x28] sm:$0xff]   ;;  %v3639_v3 = vld [vmem:[%s4449_s4 + $0x1] ss:$0 sm:$0xff] }
 0x2b5   : > { %2975 = vpow2.f32 %v798_v6  ;;  %2688 = vmatprep.subr.bf16.mxu0 %v2920_v12  ;;  %v1238_v36 = vadd.f32 %v3476_v7, %v3639_v3  ;;  %v3139_v7 = vld [vmem:[%s3279_s26] sm:$0xff]   ;;  %v1249_v44 = vadd.f32 %v3639_v3, %v3498_v23  ;;  %v1246_v16 = vadd.f32 %v3639_v3, %v3494_v15 }
 0x2b6   : > { %v3605_v57 = vpop.eup %2965  ;;  %v800_v58 = vmul.f32 1.442695, %v769_v9  ;;  %818 = vadd.xlane.f32.xlu0 %v3603_v37  ;;  %2689 = vmatpush3.bf16.msra.mxu0 %v2920_v12 }
 0x2b7   : > { %820 = vadd.xlane.f32.xlu1 %v3605_v57  ;;  %v3612_v61 = vpop.eup %2967  ;;  %2690 = vmatprep.subr.bf16.mxu0 %v2921_v63 }
 0x2b8   : > { %2977 = vpow2.f32 %v800_v58 }
 0x2ba   : > { %v3614_v62 = vpop.eup %2969  ;;  %814 = vadd.xlane.f32.xlu0 %v3612_v61  ;;  %2691 = vmatpush3.bf16.msra.mxu0 %v2921_v63 }
 0x2bb   : > { %816 = vadd.xlane.f32.xlu1 %v3614_v62  ;;  %v3618_v60 = vpop.eup %2971  ;;  %2692 = vmatprep.subr.bf16.mxu0 %v2922_v53 }
 0x2be   : > { %v3623_v54 = vpop.eup %2973  ;;  %826 = vadd.xlane.f32.xlu0 %v3618_v60  ;;  %2693 = vmatpush3.bf16.msra.mxu0 %v2922_v53  ;;  %v1241_v53 = vadd.f32 %v3484_v10, %v3639_v3  ;;  %v1230_v10 = vadd.f32 %v3639_v3, %v3480_v8 }
 0x2bf   : > { %828 = vadd.xlane.f32.xlu1 %v3623_v54  ;;  %v3627_v39 = vpop.eup %2975 }
 0x2c2   : > { %v3632_v42 = vpop.eup %2977  ;;  %830 = vadd.xlane.f32.xlu0 %v3627_v39 }
 0x2c3   : > { %832 = vadd.xlane.f32.xlu1 %v3632_v42 }
 0x32b   : > { %v807_v1 = vpop.xlane.xlu0 %806 }
 0x32c   : > { %2979 = vrcp.f32 %v807_v1 }
 0x32d   : > { %v809_v51 = vpop.xlane.xlu1 %808 }
 0x32e   : > { %2981 = vrcp.f32 %v809_v51 }
 0x32f   : > { %v803_v52 = vpop.xlane.xlu0 %802 }
 0x330   : > { %2983 = vrcp.f32 %v803_v52 }
 0x333   : > { %v805_v2 = vpop.xlane.xlu1 %804 }
 0x334   : > { %2985 = vrcp.f32 %v805_v2  ;;  %v3661_v2 = vunpack.c.l.bf16 %v3139_v7 }
 0x336   : > { %v2980_v5 = vpop.eup %2979 }
 0x337   : > { %v813_v6 = vpop.xlane.xlu1 %812  ;;  %v3642_v4 = vmul.f32 %v2980_v5, %v3559_v59  ;;  %v3666_v5 = vunpack.c.h.bf16 %v3139_v7 }
 0x338   : > { %v2982_v9 = vpop.eup %2981  ;;  %2987 = vrcp.f32 %v813_v6 }
 0x339   : > { %v4458_v58 = vsub.f32 1.0, %v3642_v4  ;;  %v3648_v12 = vmul.f32 %v2982_v9, %v3562_v47  ;;  %v3664_v47 = vunpack.c.h.bf16 %v3298_v14 }
 0x33a   : > { %v2984_v63 = vpop.eup %2983 }
 0x33b   : > { %v811_v1 = vpop.xlane.xlu0 %810  ;;  %v3654_v51 = vmul.f32 %v1238_v36, %v4458_v58  ;;  %v4456_v59 = vsub.f32 1.0, %v3648_v12  ;;  %v3658_v52 = vmul.f32 %v2984_v63, %v3566_v49  ;;  %v3677_v36 = vunpack.c.l.bf16 %v3298_v14 }
 0x33c   : > { %2989 = vrcp.f32 %v811_v1  ;;  %v885_v7 = vmul.f32 %v3664_v47, %v3648_v12 }
 0x33d   : > { %1312 = vmax.xlane.f32.xlu0 %v3654_v51  ;;  %v3673_v6 = vmul.f32 %v1241_v53, %v4456_v59  ;;  %v4457_v49 = vsub.f32 1.0, %v3658_v52  ;;  %v1233_v53 = vadd.f32 %v3639_v3, %v3486_v11  ;;  %v884_v11 = vmul.f32 %v3677_v36, %v3642_v4 }
 0x33e   : > { %v2986_v9 = vpop.eup %2985 }
 0x33f   : > { %1314 = vmax.xlane.f32.xlu1 %v3673_v6  ;;  %v823_v63 = vpop.xlane.xlu0 %822  ;;  %v3682_v1 = vmul.f32 %v1230_v10, %v4457_v49  ;;  %v3685_v8 = vmul.f32 %v2986_v9, %v3572_v0  ;;  %v882_v10 = vmul.f32 %v3661_v2, %v3658_v52  ;;  %v899_v48 = vpack.c.bf16 %v885_v7, %v884_v11 }
 0x340   : > { %2991 = vrcp.f32 %v823_v63  ;;  %v825_v59 = vpop.xlane.xlu1 %824 }
 0x341   : > { %2993 = vrcp.f32 %v825_v59  ;;  %1308 = vmax.xlane.f32.xlu0 %v3682_v1  ;;  %v4465_v14 = vsub.f32 1.0, %v3685_v8  ;;  %v883_v0 = vmul.f32 %v3666_v5, %v3685_v8 }
 0x342   : > { %v2988_v9 = vpop.eup %2987 }
 0x343   : > { %v819_v49 = vpop.xlane.xlu0 %818  ;;  %v3701_v63 = vmul.f32 %v1233_v53, %v4465_v14  ;;  %v898_v59 = vpack.c.bf16 %v883_v0, %v882_v10  ;;  %v3704_v58 = vmul.f32 %v2988_v9, %v3576_v38 }
 0x344   : > { %2995 = vrcp.f32 %v819_v49  ;;  %v821_v45 = vpop.xlane.xlu1 %820 }
 0x345   : > { %2997 = vrcp.f32 %v821_v45  ;;  %1310 = vmax.xlane.f32.xlu1 %v3701_v63  ;;  %2694 = vmatprep.mubr.bf16.mxu0 %v898_v59  ;;  %v4459_v53 = vsub.f32 1.0, %v3704_v58 }
 0x346   : > { %v2990_v38 = vpop.eup %2989  ;;  %2695 = vmatmul.mubr.bf16.vlgmr.msra.gmra.mrb[16].mxu0 %v899_v48 }
 0x347   : > { %v815_v10 = vpop.xlane.xlu0 %814  ;;  %v3718_v7 = vmul.f32 %v1249_v44, %v4459_v53  ;;  %v3721_v49 = vmul.f32 %v2990_v38, %v3582_v50  ;;  %v887_v44 = vmul.f32 %v3710_v46, %v3704_v58 }
 0x348   : > { %2999 = vrcp.f32 %v815_v10  ;;  %v817_v23 = vpop.xlane.xlu1 %816 }
 0x349   : > { %3001 = vrcp.f32 %v817_v23  ;;  %1318 = vmax.xlane.f32.xlu1 %v3718_v7  ;;  %v4460_v45 = vsub.f32 1.0, %v3721_v49  ;;  %v886_v48 = vmul.f32 %v3707_v40, %v3721_v49  ;;  %v1270_v23 = vadd.f32 %v3500_v24, %v3639_v3 }
 0x34a   : > { %v2992_v0 = vpop.eup %2991 }
 0x34b   : > { %v2994_v9 = vpop.eup %2993  ;;  %v827_v50 = vpop.xlane.xlu0 %826  ;;  %v3733_v11 = vmul.f32 %v1246_v16, %v4460_v45  ;;  %v900_v15 = vpack.c.bf16 %v887_v44, %v886_v48  ;;  %v3736_v59 = vmul.f32 %v2992_v0, %v3593_v55  ;;  %v1273_v48 = vadd.f32 %v3504_v27, %v3639_v3 }
 0x34c   : > { %3003 = vrcp.f32 %v827_v50  ;;  %v829_v38 = vpop.xlane.xlu1 %828  ;;  %v3739_v10 = vmul.f32 %v2994_v9, %v3595_v56  ;;  %v3749_v0 = vunpack.c.l.bf16 %v3307_v17  ;;  %v3759_v50 = vunpack.c.l.bf16 %v3311_v18 }
 0x34d   : > { %3005 = vrcp.f32 %v829_v38  ;;  %1316 = vmax.xlane.f32.xlu0 %v3733_v11  ;;  %2698 = vmatprep.mubr.bf16.mxu0 %v900_v15  ;;  %v4464_v53 = vsub.f32 1.0, %v3736_v59  ;;  %v3769_v45 = vunpack.c.h.bf16 %v3311_v18 }
 0x34e   : > { %v2996_v16 = vpop.eup %2995  ;;  %v4461_v55 = vsub.f32 1.0, %v3739_v10  ;;  %4497 = vst [vmem:[#allocation15_spill] sm:$0xff] %v3749_v0  ;;  %4498 = vst [vmem:[#allocation16_spill] sm:$0xff] %v3759_v50 }
 0x34f   : > { %v2998_v44 = vpop.eup %2997  ;;  %v831_v56 = vpop.xlane.xlu0 %830  ;;  %v3753_v24 = vmul.f32 %v1270_v23, %v4464_v53  ;;  %v3756_v9 = vmul.f32 %v2996_v16, %v3603_v37  ;;  %4499 = vst [vmem:[#allocation17_spill] sm:$0xff] %v3769_v45  ;;  %v1262_v23 = vadd.f32 %v3639_v3, %v3502_v26  ;;  %v3816_v53 = vunpack.c.h.bf16 %v3315_v19 }
 0x350   : > { %3007 = vrcp.f32 %v831_v56  ;;  %v833_v15 = vpop.xlane.xlu1 %832  ;;  %v3763_v27 = vmul.f32 %v1273_v48, %v4461_v55  ;;  %v3766_v38 = vmul.f32 %v2998_v44, %v3605_v57  ;;  %v3776_v56 = vunpack.c.h.bf16 %v3307_v17 }
 0x351   : > { %3009 = vrcp.f32 %v833_v15  ;;  %1328 = vmax.xlane.f32.xlu0 %v3753_v24  ;;  %v4463_v37 = vsub.f32 1.0, %v3756_v9  ;;  %v1265_v48 = vadd.f32 %v3639_v3, %v3506_v28  ;;  %v1254_v15 = vadd.f32 %v3491_v13, %v3639_v3 }
 0x352   : > { %v3000_v16 = vpop.eup %2999  ;;  %4500 = vst [vmem:[#allocation18_spill] sm:$0xff] %v3776_v56  ;;  %1330 = vmax.xlane.f32.xlu1 %v3763_v27  ;;  %v4462_v18 = vsub.f32 1.0, %v3766_v38  ;;  %v891_v13 = vmul.f32 %v3769_v45, %v3766_v38  ;;  %v3826_v45 = vunpack.c.l.bf16 %v3320_v20 }
 0x353   : > { %v3002_v57 = vpop.eup %3001  ;;  %v3784_v26 = vmul.f32 %v1262_v23, %v4463_v37  ;;  %v3787_v44 = vmul.f32 %v3000_v16, %v3612_v61  ;;  %v890_v61 = vmul.f32 %v3759_v50, %v3756_v9  ;;  %v3813_v37 = vunpack.c.l.bf16 %v3315_v19 }
 0x354   : > { %v3793_v17 = vmul.f32 %v1265_v48, %v4462_v18  ;;  %v3796_v28 = vmul.f32 %v3002_v57, %v3614_v62  ;;  %v1257_v48 = vadd.f32 %v3496_v22, %v3639_v3  ;;  %v3836_v19 = vunpack.c.h.bf16 %v3320_v20 }
 0x355   : > { %1324 = vmax.xlane.f32.xlu0 %v3784_v26  ;;  %v4474_v55 = vsub.f32 1.0, %v3787_v44  ;;  %v888_v23 = vmul.f32 %v3749_v0, %v3787_v44 }
 0x356   : > { %v3004_v16 = vpop.eup %3003  ;;  %1326 = vmax.xlane.f32.xlu1 %v3793_v17  ;;  %v4479_v62 = vsub.f32 1.0, %v3796_v28  ;;  %v889_v57 = vmul.f32 %v3776_v56, %v3796_v28 }
 0x357   : > { %v3006_v18 = vpop.eup %3005  ;;  %v3820_v14 = vmul.f32 %v1254_v15, %v4474_v55  ;;  %v3823_v22 = vmul.f32 %v3004_v16, %v3618_v60  ;;  %v1278_v15 = vadd.f32 %v3639_v3, %v3510_v30  ;;  %v902_v60 = vpack.c.bf16 %v891_v13, %v890_v61 }
 0x358   : > { %v3830_v56 = vmul.f32 %v1257_v48, %v4479_v62  ;;  %v901_v0 = vpack.c.bf16 %v889_v57, %v888_v23  ;;  %v3833_v50 = vmul.f32 %v3006_v18, %v3623_v54  ;;  %v1281_v48 = vadd.f32 %v3639_v3, %v3514_v32 }
 0x359   : > { %1320 = vmax.xlane.f32.xlu0 %v3820_v14  ;;  %v4478_v16 = vsub.f32 1.0, %v3823_v22  ;;  %v893_v61 = vmul.f32 %v3816_v53, %v3739_v10  ;;  %v1286_v13 = vadd.f32 %v3508_v29, %v3639_v3  ;;  %v1289_v57 = vadd.f32 %v3512_v31, %v3639_v3 }
 0x35a   : > { %v3008_v55 = vpop.eup %3007  ;;  %1322 = vmax.xlane.f32.xlu1 %v3830_v56  ;;  %2699 = vmatmul.mubr.bf16.gmra.mrb[20].mxu0 %v901_v0  ;;  %v4475_v54 = vsub.f32 1.0, %v3833_v50  ;;  %v892_v0 = vmul.f32 %v3813_v37, %v3736_v59 }
 0x35b   : > { %v3010_v18 = vpop.eup %3009  ;;  %2702 = vmatprep.mubr.bf16.mxu0 %v902_v60  ;;  %v3848_v20 = vmul.f32 %v1278_v15, %v4478_v16  ;;  %v3851_v30 = vmul.f32 %v3008_v55, %v3627_v39  ;;  %v894_v55 = vmul.f32 %v3826_v45, %v3823_v22  ;;  %v3881_v60 = vunpack.c.l.bf16 %v3325_v21 }
 0x35c   : > { %v3855_v23 = vmul.f32 %v1281_v48, %v4475_v54  ;;  %v3858_v32 = vmul.f32 %v3010_v18, %v3632_v42  ;;  %v895_v42 = vmul.f32 %v3836_v19, %v3833_v50  ;;  %v3884_v48 = vunpack.c.h.bf16 %v3325_v21 }
 0x35d   : > { %1332 = vmax.xlane.f32.xlu0 %v3848_v20  ;;  %v4477_v39 = vsub.f32 1.0, %v3851_v30  ;;  %v903_v54 = vpack.c.bf16 %v893_v61, %v892_v0  ;;  %v896_v3 = vmul.f32 %v3881_v60, %v3851_v30  ;;  %v2924_v0 = vld [vmem:[%s4450_s5 + $0x48] sm:$0xff]  }
 0x35e   : > { %1334 = vmax.xlane.f32.xlu1 %v3855_v23  ;;  %v4476_v15 = vsub.f32 1.0, %v3858_v32  ;;  %4501 = vst [vmem:[#allocation19_spill] sm:$0xff] %v3884_v48  ;;  %v904_v31 = vpack.c.bf16 %v895_v42, %v894_v55 }
 0x35f   : > { %v3878_v29 = vmul.f32 %v1286_v13, %v4477_v39  ;;  %v897_v13 = vmul.f32 %v3884_v48, %v3858_v32 }
 0x360   : > { %v3888_v18 = vmul.f32 %v1289_v57, %v4476_v15  ;;  %v2923_v57 = vld [vmem:[%s4450_s5 + $0x40] sm:$0xff]  }
 0x361   : > { %1336 = vmax.xlane.f32.xlu0 %v3878_v29  ;;  %v905_v21 = vpack.c.bf16 %v897_v13, %v896_v3  ;;  %2742 = vmatprep.subr.bf16.mxu0 %v2923_v57 }
 0x362   : > { %1338 = vmax.xlane.f32.xlu1 %v3888_v18  ;;  %2703 = vmatmul.mubr.bf16.gmra.mrb[24].mxu0 %v903_v54 }
 0x363   : > { %2706 = vmatprep.mubr.bf16.mxu0 %v904_v31  ;;  %2743 = vmatpush3.bf16.msra.mxu0 %v2923_v57 }
 0x364   : > { %2744 = vmatprep.subr.bf16.mxu0 %v2924_v0 }
 0x367   : > { %2745 = vmatpush3.bf16.msra.mxu0 %v2924_v0 }
 0x36a   : > { %2707 = vmatmul.mubr.bf16.gmra.mrb[28].mxu0 %v905_v21 }
 0x3ca   : > { %v1313_v54 = vpop.xlane.xlu0 %1312 }
 0x3cb   : > { %v1342_v61 = vsub.f32 %v3654_v51, %v1313_v54 }
 0x3cc   : > { %v1315_v55 = vpop.xlane.xlu1 %1314 }
 0x3cd   : > { %v1360_v42 = vmul.f32 1.442695, %v1342_v61  ;;  %v1343_v31 = vsub.f32 %v3673_v6, %v1315_v55 }
 0x3ce   : > { %v1309_v3 = vpop.xlane.xlu0 %1308 }
 0x3cf   : > { %3011 = vpow2.f32 %v1360_v42  ;;  %v1362_v13 = vmul.f32 1.442695, %v1343_v31  ;;  %v1340_v21 = vsub.f32 %v3682_v1, %v1309_v3 }
 0x3d1   : > { %3013 = vpow2.f32 %v1362_v13  ;;  %v1356_v15 = vmul.f32 1.442695, %v1340_v21 }
 0x3d2   : > { %v1311_v39 = vpop.xlane.xlu1 %1310 }
 0x3d3   : > { %3015 = vpow2.f32 %v1356_v15  ;;  %v1341_v57 = vsub.f32 %v3701_v63, %v1311_v39 }
 0x3d5   : > { %v1358_v16 = vmul.f32 1.442695, %v1341_v57 }
 0x3d6   : > { %v1319_v62 = vpop.xlane.xlu1 %1318 }
 0x3d7   : > { %3017 = vpow2.f32 %v1358_v16  ;;  %v1345_v51 = vsub.f32 %v3718_v7, %v1319_v62 }
 0x3d9   : > { %v3907_v0 = vpop.eup %3011  ;;  %v1366_v54 = vmul.f32 1.442695, %v1345_v51 }
 0x3da   : > { %1392 = vadd.xlane.f32.xlu0 %v3907_v0  ;;  %v1317_v6 = vpop.xlane.xlu0 %1316 }
 0x3db   : > { %v3910_v61 = vpop.eup %3013  ;;  %3019 = vpow2.f32 %v1366_v54  ;;  %v1344_v1 = vsub.f32 %v3733_v11, %v1317_v6 }
 0x3dc   : > { %1394 = vadd.xlane.f32.xlu1 %v3910_v61 }
 0x3dd   : > { %v3914_v15 = vpop.eup %3015  ;;  %v1364_v63 = vmul.f32 1.442695, %v1344_v1 }
 0x3de   : > { %1388 = vadd.xlane.f32.xlu0 %v3914_v15  ;;  %v1329_v16 = vpop.xlane.xlu0 %1328 }
 0x3df   : > { %3021 = vpow2.f32 %v1364_v63  ;;  %v1350_v7 = vsub.f32 %v3753_v24, %v1329_v16  ;;  %v1331_v62 = vpop.xlane.xlu1 %1330 }
 0x3e0   : > { %v1351_v39 = vsub.f32 %v3763_v27, %v1331_v62 }
 0x3e1   : > { %v3919_v55 = vpop.eup %3017  ;;  %v1376_v42 = vmul.f32 1.442695, %v1350_v7 }
 0x3e2   : > { %v1378_v31 = vmul.f32 1.442695, %v1351_v39  ;;  %1390 = vadd.xlane.f32.xlu1 %v3919_v55  ;;  %v1325_v11 = vpop.xlane.xlu0 %1324 }
 0x3e3   : > { %3023 = vpow2.f32 %v1376_v42  ;;  %v1348_v3 = vsub.f32 %v3784_v26, %v1325_v11  ;;  %v1327_v13 = vpop.xlane.xlu1 %1326 }
 0x3e4   : > { %3025 = vpow2.f32 %v1378_v31  ;;  %v1349_v21 = vsub.f32 %v3793_v17, %v1327_v13  ;;  %v2925_v17 = vld [vmem:[%s4450_s5 + $0x50] sm:$0xff]  }
 0x3e5   : > { %v3924_v57 = vpop.eup %3019  ;;  %v1372_v24 = vmul.f32 1.442695, %v1348_v3  ;;  %2746 = vmatprep.subr.bf16.mxu0 %v2925_v17 }
 0x3e6   : > { %v1374_v51 = vmul.f32 1.442695, %v1349_v21  ;;  %1398 = vadd.xlane.f32.xlu1 %v3924_v57  ;;  %v1321_v27 = vpop.xlane.xlu0 %1320  ;;  %2747 = vmatpush3.bf16.msra.mxu0 %v2925_v17 }
 0x3e7   : > { %3027 = vpow2.f32 %v1372_v24  ;;  %v1346_v54 = vsub.f32 %v3820_v14, %v1321_v27  ;;  %v1323_v6 = vpop.xlane.xlu1 %1322  ;;  %v2927_v24 = vld [vmem:[%s4450_s5 + $0x60] sm:$0xff]  }
 0x3e8   : > { %3029 = vpow2.f32 %v1374_v51  ;;  %v1347_v1 = vsub.f32 %v3830_v56, %v1323_v6  ;;  %v2926_v56 = vld [vmem:[%s4450_s5 + $0x58] sm:$0xff]  }
 0x3e9   : > { %v3929_v63 = vpop.eup %3021  ;;  %v1368_v26 = vmul.f32 1.442695, %v1346_v54  ;;  %2748 = vmatprep.subr.bf16.mxu0 %v2926_v56 }
 0x3ea   : > { %v1370_v16 = vmul.f32 1.442695, %v1347_v1  ;;  %1396 = vadd.xlane.f32.xlu0 %v3929_v63  ;;  %v1333_v7 = vpop.xlane.xlu0 %1332  ;;  %2749 = vmatpush3.bf16.msra.mxu0 %v2926_v56 }
 0x3eb   : > { %3031 = vpow2.f32 %v1368_v26  ;;  %v1352_v62 = vsub.f32 %v3848_v20, %v1333_v7  ;;  %v1335_v39 = vpop.xlane.xlu1 %1334  ;;  %2750 = vmatprep.subr.bf16.mxu0 %v2927_v24  ;;  %v2929_v26 = vld [vmem:[%s4450_s5 + $0x70] sm:$0xff]  }
 0x3ec   : > { %3033 = vpow2.f32 %v1370_v16  ;;  %v1353_v14 = vsub.f32 %v3855_v23, %v1335_v39 }
 0x3ed   : > { %v3940_v42 = vpop.eup %3023  ;;  %v1380_v31 = vmul.f32 1.442695, %v1352_v62  ;;  %v2930_v62 = vld [vmem:[%s4450_s5 + $0x78] sm:$0xff]  }
 0x3ee   : > { %v3942_v11 = vpop.eup %3025  ;;  %v1382_v3 = vmul.f32 1.442695, %v1353_v14  ;;  %1408 = vadd.xlane.f32.xlu0 %v3940_v42  ;;  %v1337_v13 = vpop.xlane.xlu0 %1336  ;;  %2751 = vmatpush3.bf16.msra.mxu0 %v2927_v24 }
 0x3ef   : > { %3035 = vpow2.f32 %v1380_v31  ;;  %v1354_v20 = vsub.f32 %v3878_v29, %v1337_v13  ;;  %1410 = vadd.xlane.f32.xlu1 %v3942_v11  ;;  %v1339_v23 = vpop.xlane.xlu1 %1338  ;;  %v2928_v29 = vld [vmem:[%s4450_s5 + $0x68] sm:$0xff]  }
 0x3f0   : > { %3037 = vpow2.f32 %v1382_v3  ;;  %v1355_v21 = vsub.f32 %v3888_v18, %v1339_v23  ;;  %2752 = vmatprep.subr.bf16.mxu0 %v2928_v29 }
 0x3f1   : > { %v3951_v51 = vpop.eup %3027  ;;  %v1384_v27 = vmul.f32 1.442695, %v1354_v20 }
 0x3f2   : > { %v3953_v54 = vpop.eup %3029  ;;  %v1386_v6 = vmul.f32 1.442695, %v1355_v21  ;;  %1404 = vadd.xlane.f32.xlu0 %v3951_v51  ;;  %2753 = vmatpush3.bf16.msra.mxu0 %v2928_v29 }
 0x3f3   : > { %3039 = vpow2.f32 %v1384_v27  ;;  %1406 = vadd.xlane.f32.xlu1 %v3953_v54  ;;  %2754 = vmatprep.subr.bf16.mxu0 %v2929_v26 }
 0x3f4   : > { %3041 = vpow2.f32 %v1386_v6 }
 0x3f5   : > { %v3960_v18 = vpop.eup %3031 }
 0x3f6   : > { %v3962_v1 = vpop.eup %3033  ;;  %1400 = vadd.xlane.f32.xlu0 %v3960_v18  ;;  %2755 = vmatpush3.bf16.msra.mxu0 %v2929_v26 }
 0x3f7   : > { %1402 = vadd.xlane.f32.xlu1 %v3962_v1  ;;  %2756 = vmatprep.subr.bf16.mxu0 %v2930_v62 }
 0x3f9   : > { %v3969_v17 = vpop.eup %3035 }
 0x3fa   : > { %v3971_v16 = vpop.eup %3037  ;;  %1412 = vadd.xlane.f32.xlu0 %v3969_v17  ;;  %2757 = vmatpush3.bf16.msra.mxu0 %v2930_v62 }
 0x3fb   : > { %1414 = vadd.xlane.f32.xlu1 %v3971_v16 }
 0x3fd   : > { %v3975_v7 = vpop.eup %3039 }
 0x3fe   : > { %v3980_v39 = vpop.eup %3041  ;;  %1416 = vadd.xlane.f32.xlu0 %v3975_v7 }
 0x3ff   : > { %1418 = vadd.xlane.f32.xlu1 %v3980_v39 }
 0x419   : > { %v3984_v14 = vpop.f32.mrb[16].mxu0 }
 0x41a   : > { %4502 = vst [vmem:[#allocation20_spill] sm:$0xff] %v3984_v14  ;;  %v3986_v56 = vpop.f32.mrb[17].mxu0 }
 0x41b   : > { %4503 = vst [vmem:[#allocation21_spill] sm:$0xff] %v3986_v56  ;;  %v3988_v31 = vpop.f32.mrb[18].mxu0 }
 0x41c   : > { %4504 = vst [vmem:[#allocation22_spill] sm:$0xff] %v3988_v31  ;;  %v3990_v3 = vpop.f32.mrb[19].mxu0 }
 0x41d   : > { %4505 = vst [vmem:[#allocation23_spill] sm:$0xff] %v3990_v3 }
 0x42d   : > { %v3992_v13 = vpop.f32.mrb[20].mxu0 }
 0x42e   : > { %4506 = vst [vmem:[#allocation24_spill] sm:$0xff] %v3992_v13  ;;  %v3994_v20 = vpop.f32.mrb[21].mxu0 }
 0x42f   : > { %4507 = vst [vmem:[#allocation25_spill] sm:$0xff] %v3994_v20  ;;  %v3996_v23 = vpop.f32.mrb[22].mxu0 }
 0x430   : > { %4508 = vst [vmem:[#allocation26_spill] sm:$0xff] %v3996_v23  ;;  %v3998_v21 = vpop.f32.mrb[23].mxu0 }
 0x431   : > { %4509 = vst [vmem:[#allocation27_spill] sm:$0xff] %v3998_v21 }
 0x435   : > { %v4000_v24 = vpop.f32.mrb[24].mxu0 }
 0x436   : > { %4510 = vst [vmem:[#allocation28_spill] sm:$0xff] %v4000_v24  ;;  %v4002_v27 = vpop.f32.mrb[25].mxu0 }
 0x437   : > { %4511 = vst [vmem:[#allocation29_spill] sm:$0xff] %v4002_v27  ;;  %v4004_v6 = vpop.f32.mrb[26].mxu0 }
 0x438   : > { %4512 = vst [vmem:[#allocation30_spill] sm:$0xff] %v4004_v6  ;;  %v4006_v29 = vpop.f32.mrb[27].mxu0 }
 0x439   : > { %4513 = vst [vmem:[#allocation31_spill] sm:$0xff] %v4006_v29 }
 0x43d   : > { %v4008_v26 = vpop.f32.mrb[28].mxu0 }
 0x43e   : > { %4514 = vst [vmem:[#allocation32_spill] sm:$0xff] %v4008_v26  ;;  %v4010_v62 = vpop.f32.mrb[29].mxu0 }
 0x43f   : > { %4515 = vst [vmem:[#allocation33_spill] sm:$0xff] %v4010_v62  ;;  %v4012_v3 = vpop.f32.mrb[30].mxu0  ;;  %v4020_v62 = vld [vmem:[%s4449_s4 + $0x2] ss:$0 sm:$0xff] }
 0x440   : > { %4516 = vst [vmem:[#allocation34_spill] sm:$0xff] %v4012_v3  ;;  %v4014_v13 = vpop.f32.mrb[31].mxu0 }
 0x441   : > { %4517 = vst [vmem:[#allocation35_spill] sm:$0xff] %v4014_v13 }
 0x467   : > { %v1393_v20 = vpop.xlane.xlu0 %1392 }
 0x468   : > { %3043 = vrcp.f32 %v1393_v20 }
 0x469   : > { %v1395_v23 = vpop.xlane.xlu1 %1394 }
 0x46a   : > { %3045 = vrcp.f32 %v1395_v23  ;;  %v1826_v23 = vadd.f32 %v3516_v25, %v4020_v62  ;;  %v1818_v25 = vadd.f32 %v4020_v62, %v3518_v33 }
 0x46b   : > { %v1389_v21 = vpop.xlane.xlu0 %1388 }
 0x46c   : > { %3047 = vrcp.f32 %v1389_v21 }
 0x46f   : > { %v1391_v24 = vpop.xlane.xlu1 %1390 }
 0x470   : > { %3049 = vrcp.f32 %v1391_v24  ;;  %v4518_v24 = vsub.f32 1.0, %v3642_v4 }
 0x472   : > { %v3044_v27 = vpop.eup %3043 }
 0x473   : > { %v1399_v6 = vpop.xlane.xlu1 %1398  ;;  %v1438_v29 = vmul.f32 %v3044_v27, %v3907_v0  ;;  %v1829_v27 = vadd.f32 %v3520_v34, %v4020_v62 }
 0x474   : > { %v3046_v31 = vpop.eup %3045  ;;  %3051 = vrcp.f32 %v1399_v6  ;;  %v4519_v6 = vsub.f32 1.0, %v3648_v12 }
 0x475   : > { %v1680_v13 = vsub.f32 1.0, %v1438_v29  ;;  %v1439_v20 = vmul.f32 %v3046_v31, %v3910_v61 }
 0x476   : > { %v3048_v3 = vpop.eup %3047 }
 0x477   : > { %v1397_v21 = vpop.xlane.xlu0 %1396  ;;  %v1696_v26 = vmul.f32 %v1680_v13, %v4518_v24  ;;  %v1681_v56 = vsub.f32 1.0, %v1439_v20  ;;  %v1436_v0 = vmul.f32 %v3048_v3, %v3914_v15  ;;  %v4520_v15 = vsub.f32 1.0, %v3658_v52 }
 0x478   : > { %3053 = vrcp.f32 %v1397_v21  ;;  %v1455_v12 = vmul.f32 %v1439_v20, %v3664_v47  ;;  %v1454_v52 = vmul.f32 %v1438_v29, %v3677_v36 }
 0x479   : > { %v4030_v14 = vmul.f32 %v1826_v23, %v1696_v26  ;;  %v1697_v61 = vmul.f32 %v1681_v56, %v4519_v6  ;;  %v1678_v31 = vsub.f32 1.0, %v1436_v0  ;;  %v1452_v56 = vmul.f32 %v1436_v0, %v3661_v2 }
 0x47a   : > { %v3050_v48 = vpop.eup %3049  ;;  %v4521_v0 = vsub.f32 1.0, %v3685_v8  ;;  %v4522_v8 = vsub.f32 1.0, %v3704_v58 }
 0x47b   : > { %1900 = vmax.xlane.f32.xlu0 %v4030_v14  ;;  %v1409_v4 = vpop.xlane.xlu0 %1408  ;;  %v4037_v13 = vmul.f32 %v1829_v27, %v1697_v61  ;;  %v1694_v3 = vmul.f32 %v1678_v31, %v4520_v15  ;;  %v1437_v34 = vmul.f32 %v3050_v48, %v3919_v55  ;;  %v1821_v48 = vadd.f32 %v4020_v62, %v3522_v35 }
 0x47c   : > { %3055 = vrcp.f32 %v1409_v4  ;;  %v1411_v26 = vpop.xlane.xlu1 %1410  ;;  %v1469_v61 = vpack.c.bf16 %v1455_v12, %v1454_v52  ;;  %v1837_v35 = vadd.f32 %v4020_v62, %v3536_v43 }
 0x47d   : > { %3057 = vrcp.f32 %v1411_v26  ;;  %1902 = vmax.xlane.f32.xlu1 %v4037_v13  ;;  %v4045_v33 = vmul.f32 %v1818_v25, %v1694_v3  ;;  %v1453_v23 = vmul.f32 %v1437_v34, %v3666_v5  ;;  %v1679_v21 = vsub.f32 1.0, %v1437_v34 }
 0x47e   : > { %v3052_v24 = vpop.eup %3051 }
 0x47f   : > { %1896 = vmax.xlane.f32.xlu0 %v4045_v33  ;;  %v1405_v55 = vpop.xlane.xlu0 %1404  ;;  %v1468_v20 = vpack.c.bf16 %v1453_v23, %v1452_v56  ;;  %v1695_v27 = vmul.f32 %v1679_v21, %v4521_v0  ;;  %v1441_v6 = vmul.f32 %v3052_v24, %v3924_v57  ;;  %v1834_v24 = vadd.f32 %v4020_v62, %v3532_v41 }
 0x480   : > { %3059 = vrcp.f32 %v1405_v55  ;;  %v1407_v31 = vpop.xlane.xlu1 %1406 }
 0x481   : > { %3061 = vrcp.f32 %v1407_v31  ;;  %2758 = vmatprep.mubr.bf16.mxu0 %v1468_v20  ;;  %v4055_v25 = vmul.f32 %v1821_v48, %v1695_v27  ;;  %v1683_v29 = vsub.f32 1.0, %v1441_v6  ;;  %v1457_v26 = vmul.f32 %v1441_v6, %v3710_v46 }
 0x482   : > { %v3054_v4 = vpop.eup %3053  ;;  %2759 = vmatmul.mubr.bf16.vlgmr.msra.gmra.mrb[32].mxu0 %v1469_v61 }
 0x483   : > { %1898 = vmax.xlane.f32.xlu1 %v4055_v25  ;;  %v1401_v15 = vpop.xlane.xlu0 %1400  ;;  %v1699_v3 = vmul.f32 %v1683_v29, %v4522_v8  ;;  %v1440_v57 = vmul.f32 %v3054_v4, %v3929_v63  ;;  %v4523_v63 = vsub.f32 1.0, %v3721_v49  ;;  %v4524_v49 = vld [vmem:[#allocation7_spill] sm:$0xff]  ;;  %v4525_v4 = vsub.f32 1.0, %v3736_v59 }
 0x484   : > { %3063 = vrcp.f32 %v1401_v15  ;;  %v1403_v34 = vpop.xlane.xlu1 %1402  ;;  %v1858_v29 = vadd.f32 %v4524_v49, %v4020_v62  ;;  %v4526_v15 = vld [vmem:[#allocation9_spill] sm:$0xff] }
 0x485   : > { %3065 = vrcp.f32 %v1403_v34  ;;  %v4064_v12 = vmul.f32 %v1837_v35, %v1699_v3  ;;  %v1456_v56 = vmul.f32 %v1440_v57, %v3707_v40  ;;  %v1682_v23 = vsub.f32 1.0, %v1440_v57 }
 0x486   : > { %v3056_v21 = vpop.eup %3055  ;;  %v1861_v8 = vadd.f32 %v4526_v15, %v4020_v62  ;;  %v4527_v57 = vsub.f32 1.0, %v3739_v10 }
 0x487   : > { %v3058_v43 = vpop.eup %3057  ;;  %1906 = vmax.xlane.f32.xlu1 %v4064_v12  ;;  %v1413_v58 = vpop.xlane.xlu0 %1412  ;;  %v1470_v52 = vpack.c.bf16 %v1457_v26, %v1456_v56  ;;  %v1698_v48 = vmul.f32 %v1682_v23, %v4523_v63  ;;  %v4073_v55 = vmul.f32 %v3056_v21, %v3940_v42 }
 0x488   : > { %3067 = vrcp.f32 %v1413_v58  ;;  %v1415_v20 = vpop.xlane.xlu1 %1414  ;;  %v4076_v0 = vmul.f32 %v3058_v43, %v3942_v11 }
 0x489   : > { %3069 = vrcp.f32 %v1415_v20  ;;  %2762 = vmatprep.mubr.bf16.mxu0 %v1470_v52  ;;  %v4078_v27 = vmul.f32 %v1834_v24, %v1698_v48  ;;  %v1688_v41 = vsub.f32 1.0, %v4073_v55  ;;  %v4529_v52 = vsub.f32 1.0, %v3756_v9 }
 0x48a   : > { %v3060_v6 = vpop.eup %3059  ;;  %v1689_v61 = vsub.f32 1.0, %v4076_v0  ;;  %v4531_v20 = vsub.f32 1.0, %v3766_v38  ;;  %v4536_v38 = vld [vmem:[#allocation5_spill] sm:$0xff] }
 0x48b   : > { %v3062_v31 = vpop.eup %3061  ;;  %1904 = vmax.xlane.f32.xlu0 %v4078_v27  ;;  %v1417_v42 = vpop.xlane.xlu0 %1416  ;;  %v1704_v11 = vmul.f32 %v1688_v41, %v4525_v4  ;;  %v1444_v35 = vmul.f32 %v3060_v6, %v3951_v51  ;;  %v4528_v51 = vld [vmem:[#allocation8_spill] sm:$0xff]  ;;  %v4534_v4 = vld [vmem:[#allocation17_spill] sm:$0xff] }
 0x48c   : > { %3071 = vrcp.f32 %v1417_v42  ;;  %v1419_v3 = vpop.xlane.xlu1 %1418  ;;  %v1705_v34 = vmul.f32 %v1689_v61, %v4527_v57  ;;  %v1445_v26 = vmul.f32 %v3062_v31, %v3953_v54  ;;  %v1850_v58 = vadd.f32 %v4020_v62, %v4528_v51  ;;  %v4530_v54 = vld [vmem:[#allocation10_spill] sm:$0xff]  ;;  %v4532_v61 = vld [vmem:[#allocation16_spill] sm:$0xff] }
 0x48d   : > { %3073 = vrcp.f32 %v1419_v3  ;;  %v4093_v56 = vmul.f32 %v1858_v29, %v1704_v11  ;;  %v1686_v23 = vsub.f32 1.0, %v1444_v35  ;;  %v1853_v48 = vadd.f32 %v4020_v62, %v4530_v54  ;;  %v4533_v29 = vld [vmem:[#allocation15_spill] sm:$0xff] }
 0x48e   : > { %v3064_v21 = vpop.eup %3063  ;;  %v4095_v43 = vmul.f32 %v1861_v8, %v1705_v34  ;;  %v1687_v59 = vsub.f32 1.0, %v1445_v26  ;;  %v1460_v31 = vmul.f32 %v1444_v35, %v4532_v61  ;;  %v1461_v11 = vmul.f32 %v1445_v26, %v4534_v4  ;;  %v4535_v8 = vld [vmem:[#allocation18_spill] sm:$0xff] }
 0x48f   : > { %v3066_v24 = vpop.eup %3065  ;;  %1916 = vmax.xlane.f32.xlu0 %v4093_v56  ;;  %v1702_v10 = vmul.f32 %v1686_v23, %v4529_v52  ;;  %v1442_v63 = vmul.f32 %v3064_v21, %v3960_v18  ;;  %v1842_v23 = vadd.f32 %v4536_v38, %v4020_v62  ;;  %v4539_v51 = vsub.f32 1.0, %v3796_v28 }
 0x490   : > { %1918 = vmax.xlane.f32.xlu1 %v4095_v43  ;;  %v1703_v41 = vmul.f32 %v1687_v59, %v4531_v20  ;;  %v1443_v6 = vmul.f32 %v3066_v24, %v3962_v1  ;;  %v4537_v1 = vsub.f32 1.0, %v3787_v44  ;;  %v4538_v59 = vld [vmem:[#allocation6_spill] sm:$0xff]  ;;  %v4540_v44 = vld [vmem:[#allocation12_spill] sm:$0xff]  ;;  %v4542_v28 = vsub.f32 1.0, %v3823_v22 }
 0x491   : > { %v4110_v49 = vmul.f32 %v1850_v58, %v1702_v10  ;;  %v1458_v42 = vmul.f32 %v1442_v63, %v4533_v29  ;;  %v1684_v9 = vsub.f32 1.0, %v1442_v63  ;;  %v1845_v26 = vadd.f32 %v4538_v59, %v4020_v62 }
 0x492   : > { %v3068_v18 = vpop.eup %3067  ;;  %v4114_v15 = vmul.f32 %v1853_v48, %v1703_v41  ;;  %v1459_v3 = vmul.f32 %v1443_v6, %v4535_v8  ;;  %v1685_v57 = vsub.f32 1.0, %v1443_v6  ;;  %v1472_v63 = vpack.c.bf16 %v1461_v11, %v1460_v31 }
 0x493   : > { %v3070_v34 = vpop.eup %3069  ;;  %1912 = vmax.xlane.f32.xlu0 %v4110_v49  ;;  %v1700_v35 = vmul.f32 %v1684_v9, %v4537_v1  ;;  %v1448_v21 = vmul.f32 %v3068_v18, %v3969_v17  ;;  %v1866_v20 = vadd.f32 %v4020_v62, %v4540_v44  ;;  %v4541_v9 = vld [vmem:[#allocation14_spill] sm:$0xff]  ;;  %v4543_v11 = vsub.f32 1.0, %v3833_v50  ;;  %v4544_v50 = vld [vmem:[#allocation11_spill] sm:$0xff] }
 0x494   : > { %1914 = vmax.xlane.f32.xlu1 %v4114_v15  ;;  %v1471_v24 = vpack.c.bf16 %v1459_v3, %v1458_v42  ;;  %v1701_v58 = vmul.f32 %v1685_v57, %v4539_v51  ;;  %v1449_v52 = vmul.f32 %v3070_v34, %v3971_v16  ;;  %v1869_v42 = vadd.f32 %v4020_v62, %v4541_v9  ;;  %v2932_v44 = vld [vmem:[%s4450_s5 + $0x88] sm:$0xff]  }
 0x495   : > { %v4129_v10 = vmul.f32 %v1842_v23, %v1700_v35  ;;  %v1690_v54 = vsub.f32 1.0, %v1448_v21  ;;  %v1462_v3 = vmul.f32 %v4073_v55, %v3813_v37  ;;  %v1463_v57 = vmul.f32 %v4076_v0, %v3816_v53 }
 0x496   : > { %v3072_v48 = vpop.eup %3071  ;;  %2763 = vmatmul.mubr.bf16.gmra.mrb[36].mxu0 %v1471_v24  ;;  %v4133_v17 = vmul.f32 %v1845_v26, %v1701_v58  ;;  %v1691_v41 = vsub.f32 1.0, %v1449_v52  ;;  %v1464_v22 = vmul.f32 %v1448_v21, %v3826_v45  ;;  %v1465_v23 = vmul.f32 %v1449_v52, %v3836_v19 }
 0x497   : > { %v3074_v6 = vpop.eup %3073  ;;  %1908 = vmax.xlane.f32.xlu0 %v4129_v10  ;;  %2766 = vmatprep.mubr.bf16.mxu0 %v1472_v63  ;;  %v1706_v16 = vmul.f32 %v1690_v54, %v4542_v28  ;;  %v1450_v31 = vmul.f32 %v3072_v48, %v3975_v7  ;;  %v1874_v59 = vadd.f32 %v4544_v50, %v4020_v62  ;;  %v4545_v55 = vsub.f32 1.0, %v3851_v30 }
 0x498   : > { %1910 = vmax.xlane.f32.xlu1 %v4133_v17  ;;  %v1707_v18 = vmul.f32 %v1691_v41, %v4543_v11  ;;  %v1451_v34 = vmul.f32 %v3074_v6, %v3980_v39  ;;  %v4546_v39 = vld [vmem:[#allocation13_spill] sm:$0xff]  ;;  %v1473_v21 = vpack.c.bf16 %v1463_v57, %v1462_v3  ;;  %v4547_v24 = vsub.f32 1.0, %v3858_v32 }
 0x499   : > { %v4149_v38 = vmul.f32 %v1866_v20, %v1706_v16  ;;  %v1692_v7 = vsub.f32 1.0, %v1450_v31  ;;  %v1877_v26 = vadd.f32 %v4546_v39, %v4020_v62  ;;  %v1474_v58 = vpack.c.bf16 %v1465_v23, %v1464_v22  ;;  %v4548_v62 = vld [vmem:[#allocation19_spill] sm:$0xff]  ;;  %v2931_v32 = vld [vmem:[%s4450_s5 + $0x80] sm:$0xff]  }
 0x49a   : > { %v4153_v1 = vmul.f32 %v1869_v42, %v1707_v18  ;;  %v1693_v35 = vsub.f32 1.0, %v1451_v34  ;;  %v1466_v30 = vmul.f32 %v1450_v31, %v3881_v60  ;;  %v1467_v54 = vmul.f32 %v1451_v34, %v4548_v62  ;;  %2806 = vmatprep.subr.bf16.mxu0 %v2931_v32  ;;  %2838 = vmatprep.subr.bf16.mxu1 %v2931_v32 }
 0x49b   : > { %1920 = vmax.xlane.f32.xlu0 %v4149_v38  ;;  %v1708_v0 = vmul.f32 %v1692_v7, %v4545_v55  ;;  %2807 = vmatpush3.bf16.msra.mxu0 %v2931_v32 }
 0x49c   : > { %1922 = vmax.xlane.f32.xlu1 %v4153_v1  ;;  %v1709_v51 = vmul.f32 %v1693_v35, %v4547_v24  ;;  %v1475_v48 = vpack.c.bf16 %v1467_v54, %v1466_v30  ;;  %2846 = vmatpush3.bf16.msra.mxu1 %v2931_v32 }
 0x49d   : > { %v4165_v52 = vmul.f32 %v1874_v59, %v1708_v0  ;;  %2808 = vmatprep.subr.bf16.mxu0 %v2932_v44  ;;  %2839 = vmatprep.subr.bf16.mxu1 %v2932_v44 }
 0x49e   : > { %2767 = vmatmul.mubr.bf16.gmra.mrb[40].mxu0 %v1473_v21  ;;  %v4167_v63 = vmul.f32 %v1877_v26, %v1709_v51 }
 0x49f   : > { %2770 = vmatprep.mubr.bf16.mxu0 %v1474_v58  ;;  %1924 = vmax.xlane.f32.xlu0 %v4165_v52 }
 0x4a0   : > { %1926 = vmax.xlane.f32.xlu1 %v4167_v63  ;;  %2809 = vmatpush3.bf16.msra.mxu0 %v2932_v44 }
 0x4a1   : > { %2847 = vmatpush3.bf16.msra.mxu1 %v2932_v44 }
 0x4a6   : > { %2771 = vmatmul.mubr.bf16.gmra.mrb[44].mxu0 %v1475_v48 }
 0x508   : > { %v1901_v20 = vpop.xlane.xlu0 %1900 }
 0x509   : > { %v1930_v41 = vsub.f32 %v4030_v14, %v1901_v20 }
 0x50a   : > { %v1903_v6 = vpop.xlane.xlu1 %1902 }
 0x50b   : > { %v1948_v9 = vmul.f32 1.442695, %v1930_v41  ;;  %v1931_v42 = vsub.f32 %v4037_v13, %v1903_v6 }
 0x50c   : > { %v1897_v28 = vpop.xlane.xlu0 %1896 }
 0x50d   : > { %3075 = vpow2.f32 %v1948_v9  ;;  %v1950_v16 = vmul.f32 1.442695, %v1931_v42  ;;  %v1928_v31 = vsub.f32 %v4045_v33, %v1897_v28  ;;  %v2934_v28 = vld [vmem:[%s4450_s5 + $0x98] sm:$0xff]  }
 0x50f   : > { %3077 = vpow2.f32 %v1950_v16  ;;  %v1944_v11 = vmul.f32 1.442695, %v1928_v31 }
 0x510   : > { %v1899_v18 = vpop.xlane.xlu1 %1898 }
 0x511   : > { %3079 = vpow2.f32 %v1944_v11  ;;  %v1929_v3 = vsub.f32 %v4055_v25, %v1899_v18 }
 0x513   : > { %v1946_v57 = vmul.f32 1.442695, %v1929_v3 }
 0x514   : > { %v1907_v34 = vpop.xlane.xlu1 %1906 }
 0x515   : > { %3081 = vpow2.f32 %v1946_v57  ;;  %v1933_v14 = vsub.f32 %v4064_v12, %v1907_v34  ;;  %v2935_v34 = vld [vmem:[%s4450_s5 + $0xa0] sm:$0xff]  }
 0x517   : > { %v4184_v22 = vpop.eup %3075  ;;  %v1954_v23 = vmul.f32 1.442695, %v1933_v14 }
 0x518   : > { %1980 = vadd.xlane.f32.xlu0 %v4184_v22  ;;  %v1905_v13 = vpop.xlane.xlu0 %1904 }
 0x519   : > { %v4187_v7 = vpop.eup %3077  ;;  %3083 = vpow2.f32 %v1954_v23  ;;  %v1932_v33 = vsub.f32 %v4078_v27, %v1905_v13  ;;  %v2936_v23 = vld [vmem:[%s4450_s5 + $0xa8] sm:$0xff]  }
 0x51a   : > { %1982 = vadd.xlane.f32.xlu1 %v4187_v7 }
 0x51b   : > { %v4191_v35 = vpop.eup %3079  ;;  %v1952_v25 = vmul.f32 1.442695, %v1932_v33  ;;  %v2937_v33 = vld [vmem:[%s4450_s5 + $0xb0] sm:$0xff]  }
 0x51c   : > { %1976 = vadd.xlane.f32.xlu0 %v4191_v35  ;;  %v1917_v50 = vpop.xlane.xlu0 %1916 }
 0x51d   : > { %3085 = vpow2.f32 %v1952_v25  ;;  %v1938_v12 = vsub.f32 %v4093_v56, %v1917_v50  ;;  %v1919_v59 = vpop.xlane.xlu1 %1918 }
 0x51e   : > { %v1939_v55 = vsub.f32 %v4095_v43, %v1919_v59  ;;  %v2938_v59 = vld [vmem:[%s4450_s5 + $0xb8] sm:$0xff]  }
 0x51f   : > { %v4196_v0 = vpop.eup %3081  ;;  %v1964_v39 = vmul.f32 1.442695, %v1938_v12 }
 0x520   : > { %v1966_v26 = vmul.f32 1.442695, %v1939_v55  ;;  %1978 = vadd.xlane.f32.xlu1 %v4196_v0  ;;  %v1913_v27 = vpop.xlane.xlu0 %1912 }
 0x521   : > { %3087 = vpow2.f32 %v1964_v39  ;;  %v1936_v21 = vsub.f32 %v4110_v49, %v1913_v27  ;;  %v1915_v24 = vpop.xlane.xlu1 %1914  ;;  %v4264_v39 = vld [vmem:[%s4451_s6] ss:$0 sm:$0xff]  ;;  %v4549_v27 = vld [vmem:[#allocation20_spill] sm:$0xff] }
 0x522   : > { %3089 = vpow2.f32 %v1966_v26  ;;  %v1937_v51 = vsub.f32 %v4114_v15, %v1915_v24  ;;  %v2933_v15 = vld [vmem:[%s4450_s5 + $0x90] sm:$0xff]   ;;  %v4269_v26 = vld [vmem:[%s4451_s6 + $0x1] ss:$0 sm:$0xff] }
 0x523   : > { %v4201_v58 = vpop.eup %3083  ;;  %v1960_v56 = vmul.f32 1.442695, %v1936_v21  ;;  %2810 = vmatprep.subr.bf16.mxu0 %v2933_v15  ;;  %2840 = vmatprep.subr.bf16.mxu1 %v2933_v15  ;;  %v1020_v21 = vadd.f32 %v4549_v27, %v4264_v39  ;;  %v4550_v24 = vld [vmem:[#allocation21_spill] sm:$0xff] }
 0x524   : > { %v1962_v30 = vmul.f32 1.442695, %v1937_v51  ;;  %1986 = vadd.xlane.f32.xlu1 %v4201_v58  ;;  %v1909_v43 = vpop.xlane.xlu0 %1908  ;;  %2811 = vmatpush3.bf16.msra.mxu0 %v2933_v15  ;;  %v1012_v51 = vadd.f32 %v4264_v39, %v4550_v24  ;;  %v4554_v27 = vld [vmem:[#allocation25_spill] sm:$0xff] }
 0x525   : > { %3091 = vpow2.f32 %v1960_v56  ;;  %v1934_v54 = vsub.f32 %v4129_v10, %v1909_v43  ;;  %v1911_v48 = vpop.xlane.xlu1 %1910  ;;  %2848 = vmatpush3.bf16.msra.mxu1 %v2933_v15  ;;  %2812 = vmatprep.subr.bf16.mxu0 %v2934_v28 }
 0x526   : > { %3093 = vpow2.f32 %v1962_v30  ;;  %v1935_v32 = vsub.f32 %v4133_v17, %v1911_v48  ;;  %2841 = vmatprep.subr.bf16.mxu1 %v2934_v28  ;;  %v4551_v30 = vld [vmem:[#allocation22_spill] sm:$0xff] }
 0x527   : > { %v4206_v44 = vpop.eup %3085  ;;  %v1956_v49 = vmul.f32 1.442695, %v1934_v54  ;;  %v1023_v43 = vadd.f32 %v4551_v30, %v4264_v39 }
 0x528   : > { %v1958_v20 = vmul.f32 1.442695, %v1935_v32  ;;  %1984 = vadd.xlane.f32.xlu0 %v4206_v44  ;;  %v1921_v41 = vpop.xlane.xlu0 %1920  ;;  %2813 = vmatpush3.bf16.msra.mxu0 %v2934_v28  ;;  %v4552_v32 = vld [vmem:[#allocation23_spill] sm:$0xff] }
 0x529   : > { %3095 = vpow2.f32 %v1956_v49  ;;  %v1940_v6 = vsub.f32 %v4149_v38, %v1921_v41  ;;  %v1923_v9 = vpop.xlane.xlu1 %1922  ;;  %2849 = vmatpush3.bf16.msra.mxu1 %v2934_v28  ;;  %2814 = vmatprep.subr.bf16.mxu0 %v2935_v34  ;;  %v1015_v49 = vadd.f32 %v4264_v39, %v4552_v32  ;;  %v1076_v41 = vmax.f32 %v1020_v21, 0.0 }
 0x52a   : > { %3097 = vpow2.f32 %v1958_v20  ;;  %v1941_v10 = vsub.f32 %v4153_v1, %v1923_v9  ;;  %2842 = vmatprep.subr.bf16.mxu1 %v2935_v34  ;;  %v1028_v21 = vadd.f32 %v4264_v39, %v4554_v27 }
 0x52b   : > { %v4214_v17 = vpop.eup %3087  ;;  %v1968_v42 = vmul.f32 1.442695, %v1940_v6 }
 0x52c   : > { %v4219_v16 = vpop.eup %3089  ;;  %v1970_v31 = vmul.f32 1.442695, %v1941_v10  ;;  %1996 = vadd.xlane.f32.xlu0 %v4214_v17  ;;  %v1925_v38 = vpop.xlane.xlu0 %1924  ;;  %2815 = vmatpush3.bf16.msra.mxu0 %v2935_v34 }
 0x52d   : > { %3099 = vpow2.f32 %v1968_v42  ;;  %v1942_v11 = vsub.f32 %v4165_v52, %v1925_v38  ;;  %1998 = vadd.xlane.f32.xlu1 %v4219_v16  ;;  %v1927_v1 = vpop.xlane.xlu1 %1926  ;;  %2850 = vmatpush3.bf16.msra.mxu1 %v2935_v34  ;;  %v1074_v42 = vmax.f32 %v1012_v51, 0.0  ;;  %v1077_v38 = vmax.f32 %v1023_v43, 0.0  ;;  %v4555_v51 = vld [vmem:[#allocation26_spill] sm:$0xff] }
 0x52e   : > { %3101 = vpow2.f32 %v1970_v31  ;;  %v1943_v18 = vsub.f32 %v4167_v63, %v1927_v1  ;;  %2816 = vmatprep.subr.bf16.mxu0 %v2936_v23  ;;  %2843 = vmatprep.subr.bf16.mxu1 %v2936_v23 }
 0x52f   : > { %v4225_v3 = vpop.eup %3091  ;;  %v1972_v57 = vmul.f32 1.442695, %v1942_v11 }
 0x530   : > { %v4230_v14 = vpop.eup %3093  ;;  %v1974_v52 = vmul.f32 1.442695, %v1943_v18  ;;  %1992 = vadd.xlane.f32.xlu0 %v4225_v3  ;;  %2817 = vmatpush3.bf16.msra.mxu0 %v2936_v23  ;;  %v1075_v18 = vmax.f32 %v1015_v49, 0.0 }
 0x531   : > { %3103 = vpow2.f32 %v1972_v57  ;;  %1994 = vadd.xlane.f32.xlu1 %v4230_v14  ;;  %2851 = vmatpush3.bf16.msra.mxu1 %v2936_v23 }
 0x532   : > { %3105 = vpow2.f32 %v1974_v52  ;;  %2818 = vmatprep.subr.bf16.mxu0 %v2937_v33  ;;  %2844 = vmatprep.subr.bf16.mxu1 %v2937_v33 }
 0x533   : > { %v4234_v63 = vpop.eup %3095 }
 0x534   : > { %v4239_v13 = vpop.eup %3097  ;;  %1988 = vadd.xlane.f32.xlu0 %v4234_v63  ;;  %2819 = vmatpush3.bf16.msra.mxu0 %v2937_v33 }
 0x535   : > { %1990 = vadd.xlane.f32.xlu1 %v4239_v13  ;;  %2852 = vmatpush3.bf16.msra.mxu1 %v2937_v33  ;;  %v4553_v33 = vld [vmem:[#allocation24_spill] sm:$0xff] }
 0x536   : > { %2820 = vmatprep.subr.bf16.mxu0 %v2938_v59  ;;  %2845 = vmatprep.subr.bf16.mxu1 %v2938_v59 }
 0x537   : > { %v4246_v25 = vpop.eup %3099 }
 0x538   : > { %v4248_v50 = vpop.eup %3101  ;;  %2000 = vadd.xlane.f32.xlu0 %v4246_v25  ;;  %2821 = vmatpush3.bf16.msra.mxu0 %v2938_v59 }
 0x539   : > { %2002 = vadd.xlane.f32.xlu1 %v4248_v50  ;;  %2853 = vmatpush3.bf16.msra.mxu1 %v2938_v59  ;;  %v1036_v59 = vadd.f32 %v4553_v33, %v4264_v39  ;;  %v4558_v33 = vld [vmem:[#allocation28_spill] sm:$0xff] }
 0x53a   : > { %v1052_v27 = vadd.f32 %v4558_v33, %v4264_v39 }
 0x53b   : > { %v4252_v12 = vpop.eup %3103 }
 0x53c   : > { %v4257_v55 = vpop.eup %3105  ;;  %2004 = vadd.xlane.f32.xlu0 %v4252_v12 }
 0x53d   : > { %2006 = vadd.xlane.f32.xlu1 %v4257_v55 }
 0x555   : > { %v2760_v56 = vpop.f32.mrb[32].mxu0 }
 0x556   : > { %v1592_v54 = vadd.f32 %v2760_v56, %v4269_v26  ;;  %v1583_v48 = vpop.f32.mrb[33].mxu0  ;;  %v1039_v56 = vadd.f32 %v4555_v51, %v4264_v39 }
 0x557   : > { %v1584_v15 = vadd.f32 %v4269_v26, %v1583_v48  ;;  %v2761_v20 = vpop.f32.mrb[34].mxu0 }
 0x558   : > { %v1648_v6 = vmax.f32 %v1592_v54, 0.0  ;;  %v1595_v9 = vadd.f32 %v2761_v20, %v4269_v26  ;;  %v1586_v10 = vpop.f32.mrb[35].mxu0  ;;  %v4556_v54 = vld [vmem:[#allocation27_spill] sm:$0xff] }
 0x559   : > { %v1646_v28 = vmax.f32 %v1584_v15, 0.0  ;;  %v1587_v31 = vadd.f32 %v4269_v26, %v1586_v10  ;;  %v1031_v48 = vadd.f32 %v4264_v39, %v4556_v54  ;;  %v1080_v15 = vmax.f32 %v1036_v59, 0.0 }
 0x55a   : > { %v4283_v11 = vadd.f32 %v1648_v6, %v1076_v41  ;;  %v1649_v1 = vmax.f32 %v1595_v9, 0.0  ;;  %v1078_v9 = vmax.f32 %v1028_v21, 0.0 }
 0x55b   : > { %v4285_v57 = vadd.f32 %v1646_v28, %v1074_v42  ;;  %v1647_v34 = vmax.f32 %v1587_v31, 0.0  ;;  %v1081_v28 = vmax.f32 %v1039_v56, 0.0  ;;  %v4562_v56 = vld [vmem:[#allocation30_spill] sm:$0xff] }
 0x55c   : > { %v4287_v52 = vadd.f32 %v1649_v1, %v1077_v38  ;;  %v1079_v1 = vmax.f32 %v1031_v48, 0.0 }
 0x55d   : > { %v4289_v23 = vadd.f32 %v1647_v34, %v1075_v18 }
 0x569   : > { %v2764_v24 = vpop.f32.mrb[36].mxu0 }
 0x56a   : > { %v1608_v30 = vadd.f32 %v2764_v24, %v4269_v26  ;;  %v1599_v43 = vpop.f32.mrb[37].mxu0  ;;  %v4560_v24 = vld [vmem:[#allocation29_spill] sm:$0xff] }
 0x56b   : > { %v1600_v32 = vadd.f32 %v4269_v26, %v1599_v43  ;;  %v2765_v49 = vpop.f32.mrb[38].mxu0  ;;  %v1044_v51 = vadd.f32 %v4264_v39, %v4560_v24  ;;  %v1055_v43 = vadd.f32 %v4562_v56, %v4264_v39 }
 0x56c   : > { %v1652_v20 = vmax.f32 %v1608_v30, 0.0  ;;  %v1611_v41 = vadd.f32 %v2765_v49, %v4269_v26  ;;  %v1602_v6 = vpop.f32.mrb[39].mxu0 }
 0x56d   : > { %v1650_v10 = vmax.f32 %v1600_v32, 0.0  ;;  %v1603_v42 = vadd.f32 %v4269_v26, %v1602_v6  ;;  %v4563_v32 = vld [vmem:[#allocation31_spill] sm:$0xff] }
 0x56e   : > { %v4303_v31 = vadd.f32 %v1652_v20, %v1080_v15  ;;  %v1653_v38 = vmax.f32 %v1611_v41, 0.0  ;;  %v1047_v49 = vadd.f32 %v4264_v39, %v4563_v32  ;;  %v1084_v41 = vmax.f32 %v1052_v27, 0.0 }
 0x56f   : > { %v4305_v18 = vadd.f32 %v1650_v10, %v1078_v9  ;;  %v1651_v34 = vmax.f32 %v1603_v42, 0.0  ;;  %v1082_v42 = vmax.f32 %v1044_v51, 0.0 }
 0x570   : > { %v4309_v59 = vadd.f32 %v1653_v38, %v1081_v28  ;;  %v1083_v24 = vmax.f32 %v1047_v49, 0.0 }
 0x571   : > { %4557 = vst [vmem:[#allocation7_spill] sm:$0xff] %v4305_v18  ;;  %v4313_v21 = vadd.f32 %v1651_v34, %v1079_v1  ;;  %v2768_v30 = vpop.f32.mrb[40].mxu0  ;;  %v1085_v1 = vmax.f32 %v1055_v43, 0.0  ;;  %v4566_v43 = vld [vmem:[#allocation34_spill] sm:$0xff] }
 0x572   : > { %4559 = vst [vmem:[#allocation9_spill] sm:$0xff] %v4309_v59  ;;  %v1624_v54 = vadd.f32 %v2768_v30, %v4269_v26  ;;  %v1615_v48 = vpop.f32.mrb[41].mxu0 }
 0x573   : > { %4561 = vst [vmem:[#allocation8_spill] sm:$0xff] %v4313_v21  ;;  %v1616_v15 = vadd.f32 %v4269_v26, %v1615_v48  ;;  %v2769_v20 = vpop.f32.mrb[42].mxu0  ;;  %v4564_v48 = vld [vmem:[#allocation32_spill] sm:$0xff] }
 0x574   : > { %v1656_v6 = vmax.f32 %v1624_v54, 0.0  ;;  %v1627_v9 = vadd.f32 %v2769_v20, %v4269_v26  ;;  %v1618_v10 = vpop.f32.mrb[43].mxu0  ;;  %v1068_v32 = vadd.f32 %v4564_v48, %v4264_v39  ;;  %v4565_v54 = vld [vmem:[#allocation33_spill] sm:$0xff] }
 0x575   : > { %v1654_v28 = vmax.f32 %v1616_v15, 0.0  ;;  %v1619_v38 = vadd.f32 %v4269_v26, %v1618_v10  ;;  %v1060_v20 = vadd.f32 %v4264_v39, %v4565_v54 }
 0x576   : > { %v4323_v34 = vadd.f32 %v1656_v6, %v1084_v41  ;;  %v1657_v33 = vmax.f32 %v1627_v9, 0.0  ;;  %v1071_v41 = vadd.f32 %v4566_v43, %v4264_v39  ;;  %v4567_v9 = vld [vmem:[#allocation35_spill] sm:$0xff] }
 0x577   : > { %v4325_v30 = vadd.f32 %v1654_v28, %v1082_v42  ;;  %v1655_v56 = vmax.f32 %v1619_v38, 0.0  ;;  %v1063_v10 = vadd.f32 %v4264_v39, %v4567_v9  ;;  %v1088_v38 = vmax.f32 %v1068_v32, 0.0 }
 0x578   : > { %v4329_v27 = vadd.f32 %v1657_v33, %v1085_v1  ;;  %v1089_v21 = vmax.f32 %v1071_v41, 0.0 }
 0x579   : > { %v4333_v51 = vadd.f32 %v1655_v56, %v1083_v24  ;;  %v2772_v15 = vpop.f32.mrb[44].mxu0  ;;  %v1086_v24 = vmax.f32 %v1060_v20, 0.0  ;;  %v1087_v59 = vmax.f32 %v1063_v10, 0.0 }
 0x57a   : > { %v1640_v6 = vadd.f32 %v2772_v15, %v4269_v26  ;;  %v1631_v49 = vpop.f32.mrb[45].mxu0 }
 0x57b   : > { %v1632_v42 = vadd.f32 %v4269_v26, %v1631_v49  ;;  %v2773_v28 = vpop.f32.mrb[46].mxu0 }
 0x57c   : > { %v1660_v1 = vmax.f32 %v1640_v6, 0.0  ;;  %v1643_v33 = vadd.f32 %v2773_v28, %v4269_v26  ;;  %v1634_v48 = vpop.f32.mrb[47].mxu0 }
 0x57d   : > { %v1658_v56 = vmax.f32 %v1632_v42, 0.0  ;;  %v1635_v54 = vadd.f32 %v4269_v26, %v1634_v48 }
 0x57e   : > { %v4343_v43 = vadd.f32 %v1660_v1, %v1088_v38  ;;  %v1661_v15 = vmax.f32 %v1643_v33, 0.0 }
 0x57f   : > { %v4345_v18 = vadd.f32 %v1658_v56, %v1086_v24  ;;  %v1659_v39 = vmax.f32 %v1635_v54, 0.0 }
 0x580   : > { %v4347_v9 = vadd.f32 %v1661_v15, %v1089_v21 }
 0x581   : > { %v4349_v49 = vadd.f32 %v1659_v39, %v1087_v59 }
 0x5a5   : > { %v1981_v32 = vpop.xlane.xlu0 %1980 }
 0x5a7   : > { %v1983_v6 = vpop.xlane.xlu1 %1982 }
 0x5a8   : > { %3107 = vrcp.f32 %v1983_v6 }
 0x5a9   : > { %v1977_v28 = vpop.xlane.xlu0 %1976 }
 0x5aa   : > { %3109 = vrcp.f32 %v1977_v28 }
 0x5ab   : > { %3111 = vrcp.f32 %v1981_v32 }
 0x5ad   : > { %v1979_v20 = vpop.xlane.xlu1 %1978 }
 0x5ae   : > { %3113 = vrcp.f32 %v1979_v20 }
 0x5b1   : > { %v1987_v26 = vpop.xlane.xlu1 %1986 }
 0x5b2   : > { %3115 = vrcp.f32 %v1987_v26  ;;  %v3108_v41 = vpop.eup %3107 }
 0x5b3   : > { %v2027_v1 = vmul.f32 %v3108_v41, %v4187_v7 }
 0x5b4   : > { %v3110_v42 = vpop.eup %3109 }
 0x5b5   : > { %v3112_v10 = vpop.eup %3111  ;;  %v1985_v38 = vpop.xlane.xlu0 %1984  ;;  %v2024_v59 = vmul.f32 %v3110_v42, %v4191_v35  ;;  %v2043_v56 = vmul.f32 %v2027_v1, %v3664_v47 }
 0x5b6   : > { %3117 = vrcp.f32 %v1985_v38  ;;  %v2026_v33 = vmul.f32 %v3112_v10, %v4184_v22 }
 0x5b7   : > { %v2040_v15 = vmul.f32 %v2024_v59, %v3661_v2 }
 0x5b8   : > { %v3114_v21 = vpop.eup %3113  ;;  %v2042_v7 = vmul.f32 %v2026_v33, %v3677_v36 }
 0x5b9   : > { %v1997_v48 = vpop.xlane.xlu0 %1996  ;;  %v2025_v24 = vmul.f32 %v3114_v21, %v4196_v0 }
 0x5ba   : > { %3119 = vrcp.f32 %v1997_v48  ;;  %v1999_v54 = vpop.xlane.xlu1 %1998  ;;  %v2057_v22 = vpack.c.bf16 %v2043_v56, %v2042_v7 }
 0x5bb   : > { %3121 = vrcp.f32 %v1999_v54  ;;  %v2041_v39 = vmul.f32 %v2025_v24, %v3666_v5 }
 0x5bc   : > { %v3116_v32 = vpop.eup %3115 }
 0x5bd   : > { %v1993_v6 = vpop.xlane.xlu0 %1992  ;;  %v2056_v35 = vpack.c.bf16 %v2041_v39, %v2040_v15  ;;  %v2029_v0 = vmul.f32 %v3116_v32, %v4201_v58 }
 0x5be   : > { %3123 = vrcp.f32 %v1993_v6  ;;  %v1995_v28 = vpop.xlane.xlu1 %1994 }
 0x5bf   : > { %3125 = vrcp.f32 %v1995_v28  ;;  %2822 = vmatprep.mubr.bf16.mxu0 %v2056_v35  ;;  %v2045_v36 = vmul.f32 %v2029_v0, %v3710_v46 }
 0x5c0   : > { %v3118_v47 = vpop.eup %3117  ;;  %2823 = vmatmul.mubr.bf16.vlgmr.msra.gmra.mrb[48].mxu0 %v2057_v22 }
 0x5c1   : > { %v1989_v20 = vpop.xlane.xlu0 %1988  ;;  %v2028_v26 = vmul.f32 %v3118_v47, %v4206_v44 }
 0x5c2   : > { %3127 = vrcp.f32 %v1989_v20  ;;  %v1991_v2 = vpop.xlane.xlu1 %1990 }
 0x5c3   : > { %3129 = vrcp.f32 %v1991_v2  ;;  %v2044_v5 = vmul.f32 %v2028_v26, %v3707_v40 }
 0x5c4   : > { %v3120_v41 = vpop.eup %3119 }
 0x5c5   : > { %v3122_v42 = vpop.eup %3121  ;;  %v2001_v10 = vpop.xlane.xlu0 %2000  ;;  %v2058_v38 = vpack.c.bf16 %v2045_v36, %v2044_v5  ;;  %v2034_v58 = vmul.f32 %v3120_v41, %v4214_v17 }
 0x5c6   : > { %3131 = vrcp.f32 %v2001_v10  ;;  %v2003_v1 = vpop.xlane.xlu1 %2002  ;;  %v2035_v59 = vmul.f32 %v3122_v42, %v4219_v16 }
 0x5c7   : > { %3133 = vrcp.f32 %v2003_v1  ;;  %2826 = vmatprep.mubr.bf16.mxu0 %v2058_v38  ;;  %v2050_v24 = vmul.f32 %v2034_v58, %v3813_v37 }
 0x5c8   : > { %v3124_v44 = vpop.eup %3123  ;;  %v2051_v56 = vmul.f32 %v2035_v59, %v3816_v53 }
 0x5c9   : > { %v3126_v21 = vpop.eup %3125  ;;  %v2005_v33 = vpop.xlane.xlu0 %2004  ;;  %v2032_v48 = vmul.f32 %v3124_v44, %v4225_v3 }
 0x5ca   : > { %3135 = vrcp.f32 %v2005_v33  ;;  %v2007_v40 = vpop.xlane.xlu1 %2006  ;;  %v2033_v46 = vmul.f32 %v3126_v21, %v4230_v14  ;;  %v2061_v7 = vpack.c.bf16 %v2051_v56, %v2050_v24 }
 0x5cb   : > { %3137 = vrcp.f32 %v2007_v40  ;;  %v2048_v17 = vmul.f32 %v2032_v48, %v4532_v61 }
 0x5cc   : > { %v3128_v54 = vpop.eup %3127  ;;  %v2049_v16 = vmul.f32 %v2033_v46, %v4534_v4 }
 0x5cd   : > { %v3130_v15 = vpop.eup %3129  ;;  %v2030_v39 = vmul.f32 %v3128_v54, %v4234_v63 }
 0x5ce   : > { %v2060_v32 = vpack.c.bf16 %v2049_v16, %v2048_v17  ;;  %v2031_v3 = vmul.f32 %v3130_v15, %v4239_v13 }
 0x5cf   : > { %v2046_v6 = vmul.f32 %v2030_v39, %v4533_v29 }
 0x5d0   : > { %v3132_v14 = vpop.eup %3131  ;;  %2830 = vmatprep.mubr.bf16.mxu1 %v2060_v32  ;;  %v2047_v37 = vmul.f32 %v2031_v3, %v4535_v8 }
 0x5d1   : > { %v3134_v53 = vpop.eup %3133  ;;  %2831 = vmatmul.mubr.bf16.vlgmr.msra.gmra.mrb[48].mxu1 %v2061_v7  ;;  %v2036_v61 = vmul.f32 %v3132_v14, %v4246_v25 }
 0x5d2   : > { %v2059_v35 = vpack.c.bf16 %v2047_v37, %v2046_v6  ;;  %v2037_v4 = vmul.f32 %v3134_v53, %v4248_v50 }
 0x5d3   : > { %v2052_v63 = vmul.f32 %v2036_v61, %v3826_v45  ;;  %v4386_v45 = vld [vmem:[%s4451_s6 + $0x2] ss:$0 sm:$0xff] }
 0x5d4   : > { %v3136_v28 = vpop.eup %3135  ;;  %2827 = vmatmul.mubr.bf16.gmra.mrb[52].mxu0 %v2059_v35  ;;  %v2053_v13 = vmul.f32 %v2037_v4, %v3836_v19  ;;  %v4568_v35 = vld [vmem:[#allocation7_spill] sm:$0xff] }
 0x5d5   : > { %v3138_v22 = vpop.eup %3137  ;;  %v2038_v29 = vmul.f32 %v3136_v28, %v4252_v12  ;;  %v4569_v28 = vld [vmem:[#allocation9_spill] sm:$0xff] }
 0x5d6   : > { %v2062_v0 = vpack.c.bf16 %v2053_v13, %v2052_v63  ;;  %v2039_v8 = vmul.f32 %v3138_v22, %v4257_v55 }
 0x5d7   : > { %v2054_v47 = vmul.f32 %v2038_v29, %v3881_v60 }
 0x5d8   : > { %2834 = vmatprep.mubr.bf16.mxu1 %v2062_v0  ;;  %v2055_v25 = vmul.f32 %v2039_v8, %v4548_v62 }
 0x5da   : > { %v2063_v20 = vpack.c.bf16 %v2055_v25, %v2054_v47 }
 0x5dc   : > { %2835 = vmatmul.mubr.bf16.gmra.mrb[52].mxu1 %v2063_v20 }
 0x693   : > { %v2824_v50 = vpop.f32.mrb[48].mxu0 }
 0x694   : > { %v2180_v19 = vadd.f32 %v2824_v50, %v4386_v45  ;;  %v2171_v12 = vpop.f32.mrb[49].mxu0 }
 0x695   : > { %v2172_v26 = vadd.f32 %v4386_v45, %v2171_v12  ;;  %v2825_v55 = vpop.f32.mrb[50].mxu0 }
 0x696   : > { %v2236_v2 = vmax.f32 %v2180_v19, 0.0  ;;  %v2183_v60 = vadd.f32 %v2825_v55, %v4386_v45  ;;  %v2174_v5 = vpop.f32.mrb[51].mxu0 }
 0x697   : > { %v2234_v62 = vmax.f32 %v2172_v26, 0.0  ;;  %v2175_v36 = vadd.f32 %v4386_v45, %v2174_v5 }
 0x698   : > { %v2252_v41 = vadd.f32 %v2236_v2, %v4283_v11  ;;  %v2237_v42 = vmax.f32 %v2183_v60, 0.0 }
 0x699   : > { %v2250_v10 = vadd.f32 %v2234_v62, %v4285_v57  ;;  %v2235_v38 = vmax.f32 %v2175_v36, 0.0 }
 0x69a   : > { %2268 = vst [vmem:[%s4395_s13 + $0x10] sm:$0xff] %v2252_v41  ;;  %v2253_v1 = vadd.f32 %v2237_v42, %v4287_v52 }
 0x69b   : > { %2266 = vst [vmem:[%s4395_s13] sm:$0xff] %v2250_v10  ;;  %v2251_v58 = vadd.f32 %v2235_v38, %v4289_v23 }
 0x69c   : > { %2269 = vst [vmem:[%s4395_s13 + $0x18] sm:$0xff] %v2253_v1 }
 0x69d   : > { %2267 = vst [vmem:[%s4395_s13 + $0x8] sm:$0xff] %v2251_v58 }
 0x6a4   : > { %v2832_v59 = vpop.f32.mrb[48].mxu1 }
 0x6a5   : > { %v2212_v44 = vadd.f32 %v2832_v59, %v4386_v45  ;;  %v2203_v21 = vpop.f32.mrb[49].mxu1 }
 0x6a6   : > { %v2204_v33 = vadd.f32 %v4386_v45, %v2203_v21  ;;  %v2833_v48 = vpop.f32.mrb[50].mxu1 }
 0x6a7   : > { %v2244_v11 = vmax.f32 %v2212_v44, 0.0  ;;  %v2215_v40 = vadd.f32 %v2833_v48, %v4386_v45  ;;  %v2828_v57 = vpop.f32.mrb[52].mxu0  ;;  %v2206_v46 = vpop.f32.mrb[51].mxu1 }
 0x6a8   : > { %v2242_v24 = vmax.f32 %v2204_v33, 0.0  ;;  %v2196_v52 = vadd.f32 %v2828_v57, %v4386_v45  ;;  %v2207_v23 = vadd.f32 %v4386_v45, %v2206_v46  ;;  %v2187_v56 = vpop.f32.mrb[53].mxu0 }
 0x6a9   : > { %v2260_v17 = vadd.f32 %v2244_v11, %v4323_v34  ;;  %v2245_v54 = vmax.f32 %v2215_v40, 0.0  ;;  %v2188_v16 = vadd.f32 %v4386_v45, %v2187_v56  ;;  %v2829_v15 = vpop.f32.mrb[54].mxu0 }
 0x6aa   : > { %v2258_v39 = vadd.f32 %v2242_v24, %v4325_v30  ;;  %v2240_v32 = vmax.f32 %v2196_v52, 0.0  ;;  %v2243_v3 = vmax.f32 %v2207_v23, 0.0  ;;  %v2199_v7 = vadd.f32 %v2829_v15, %v4386_v45  ;;  %v2190_v6 = vpop.f32.mrb[55].mxu0 }
 0x6ab   : > { %2276 = vst [vmem:[%s4395_s13 + $0x50] sm:$0xff] %v2260_v17  ;;  %v2261_v14 = vadd.f32 %v2245_v54, %v4329_v27  ;;  %v2238_v34 = vmax.f32 %v2188_v16, 0.0  ;;  %v2191_v37 = vadd.f32 %v4386_v45, %v2190_v6  ;;  %v4570_v27 = vld [vmem:[#allocation8_spill] sm:$0xff] }
 0x6ac   : > { %2274 = vst [vmem:[%s4395_s13 + $0x40] sm:$0xff] %v2258_v39  ;;  %v2256_v53 = vadd.f32 %v2240_v32, %v4303_v31  ;;  %v2259_v30 = vadd.f32 %v2243_v3, %v4333_v51  ;;  %v2241_v61 = vmax.f32 %v2199_v7, 0.0 }
 0x6ad   : > { %2277 = vst [vmem:[%s4395_s13 + $0x58] sm:$0xff] %v2261_v14  ;;  %v2254_v4 = vadd.f32 %v2238_v34, %v4568_v35  ;;  %v2239_v63 = vmax.f32 %v2191_v37, 0.0 }
 0x6ae   : > { %2272 = vst [vmem:[%s4395_s13 + $0x30] sm:$0xff] %v2256_v53  ;;  %2275 = vst [vmem:[%s4395_s13 + $0x48] sm:$0xff] %v2259_v30  ;;  %v2257_v13 = vadd.f32 %v2241_v61, %v4569_v28 }
 0x6af   : > { %2270 = vst [vmem:[%s4395_s13 + $0x20] sm:$0xff] %v2254_v4  ;;  %v2255_v22 = vadd.f32 %v2239_v63, %v4570_v27  ;;  %v2836_v29 = vpop.f32.mrb[52].mxu1 }
 0x6b0   : > { %2273 = vst [vmem:[%s4395_s13 + $0x38] sm:$0xff] %v2257_v13  ;;  %v2228_v0 = vadd.f32 %v2836_v29, %v4386_v45  ;;  %v2219_v31 = vpop.f32.mrb[53].mxu1 }
 0x6b1   : > { %2271 = vst [vmem:[%s4395_s13 + $0x28] sm:$0xff] %v2255_v22  ;;  %v2220_v51 = vadd.f32 %v4386_v45, %v2219_v31  ;;  %v2837_v8 = vpop.f32.mrb[54].mxu1 }
 0x6b2   : > { %v2248_v47 = vmax.f32 %v2228_v0, 0.0  ;;  %v2231_v25 = vadd.f32 %v2837_v8, %v4386_v45  ;;  %v2222_v20 = vpop.f32.mrb[55].mxu1 }
 0x6b3   : > { %v2246_v50 = vmax.f32 %v2220_v51, 0.0  ;;  %v2223_v19 = vadd.f32 %v4386_v45, %v2222_v20 }
 0x6b4   : > { %v2264_v12 = vadd.f32 %v2248_v47, %v4343_v43  ;;  %v2249_v26 = vmax.f32 %v2231_v25, 0.0 }
 0x6b5   : > { %v2262_v55 = vadd.f32 %v2246_v50, %v4345_v18  ;;  %v2247_v2 = vmax.f32 %v2223_v19, 0.0 }
 0x6b6   : > { %2280 = vst [vmem:[%s4395_s13 + $0x70] sm:$0xff] %v2264_v12  ;;  %v2265_v60 = vadd.f32 %v2249_v26, %v4347_v9 }
 0x6b7   : > { %2278 = vst [vmem:[%s4395_s13 + $0x60] sm:$0xff] %v2262_v55  ;;  %v2263_v5 = vadd.f32 %v2247_v2, %v4349_v49 }
 0x6b8   : > { %2281 = vst [vmem:[%s4395_s13 + $0x78] sm:$0xff] %v2265_v60 }
 0x6b9   : > { %2279 = vst [vmem:[%s4395_s13 + $0x68] sm:$0xff] %v2263_v5 }
 0x6ba PF: > { %s18_s24 = sadd.s32 1, %s3178_s24  }
 0x6bb   : > { %p15_p3 = scmp.ge.s32.totalorder %s18_s24, 4  }
 0x6bd   :  { %17 = sbr.rel (!%p15_p3) target bundleno = 1 (0x1), region = 91 }
 0x6c4   :  { %2304 = vsyncpa [#allocation3], 1 }
 0x6c5   :  { %2306 = vsyncpa [#allocation3 + $0x1], 1 }

</bundles_post_ra>
